<compile_context>
chip_gen: v6e
topology: v6e:2x2x1
jax: 0.10.0
libtpu: 0.0.40
codegen_flags: <defaults>
</compile_context>

<pallas_src>
import jax
import jax.numpy as jnp
from jax.experimental import pallas as pl
from jax.experimental.pallas import tpu as pltpu


def _block_diag(w, reps):
    """(k, n) -> (reps*k, reps*n) block-diagonal with `w` repeated on the diagonal."""
    k, n = w.shape
    eye = jnp.eye(reps, dtype=w.dtype)
    return (eye[:, None, :, None] * w[None, :, None, :]).reshape(reps * k, reps * n)


def _choose_i_tile(hw, p, max_rows=2048):
    """Largest divisor of HW (multiple of 8, or HW itself) keeping the pair-stage
    intermediates at <= max_rows x 128 (VMEM-safe even on v7x)."""
    divs = [d for d in range(1, hw + 1) if hw % d == 0 and (d % 8 == 0 or d == hw)]
    ok = [d for d in divs if d * hw // p <= max_rows]
    return max(ok) if ok else min(divs)


def pack_rn_params(params, compute_dtype=jnp.bfloat16):
    """One-time weight preprocessing (hoisted out of the per-call path).

    Folds the 1x1-conv projection into g_mlp layer 1 and builds lane-packed
    (P x P block-diagonal / tiled) weights so every vreg lane and MXU column
    is live inside the kernel.  `compute_dtype` is the MXU operand dtype for
    the dominant layer-2/3 matmuls (layer 1 stays f32).
    """
    C, Cp = params["wp"].shape
    assert Cp == C // 2 and 128 % Cp == 0
    P = 128 // Cp

    wp = params["wp"].astype(jnp.float32)              # (C, Cp)
    bp = params["bp"].reshape(1, Cp).astype(jnp.float32)

    # proj folded into layer 1:  x@w1a = im@(wp@w1a) + bp@w1a  (same for w1b).
    w1a_f = wp @ params["w1a"]                          # (C, Cp)  j-side
    w1b_f = wp @ params["w1b"]                          # (C, Cp)  i-side
    b1_f = bp @ params["w1a"] + bp @ params["w1b"] + params["b1"].reshape(1, Cp)

    packed = {
        "w1a_bd": _block_diag(w1a_f, P),                              # (P*C, P*Cp) f32
        "w1b_t":  jnp.tile(w1b_f, (1, P)),                            # (C, P*Cp)   f32
        "b1_t":   jnp.tile(b1_f, (1, P)),                             # (1, P*Cp)   f32
        "w2_bd":  _block_diag(params["w2"], P).astype(compute_dtype),  # (128, 128)
        "b2_t":   jnp.tile(params["b2"].reshape(1, Cp), (1, P)).astype(jnp.float32),
        "w3_bd":  _block_diag(params["w3"], P).astype(compute_dtype),  # (128, 128)
        "b3_t":   jnp.tile(params["b3"].reshape(1, Cp), (1, P)).astype(jnp.float32),
    }
    return packed


def _rn_pair_kernel(im_i_ref, im_j_ref,
                    w1a_bd_ref, w1b_t_ref, b1_t_ref,
                    w2_bd_ref, b2_t_ref,
                    w3_bd_ref, b3_t_ref,
                    out_ref):
    """Grid = (B, NI). One step computes sum_{i in block, all j} g([x[j], x[i]]).

    Lane-packed layout: one 128-lane row carries P = 128 // Cp spatial
    positions' Cp-wide feature vectors; the MLP weights are P x P
    block-diagonal so each Cp-lane group is an independent pair.
    The 1x1-conv projection is pre-folded into w1a/w1b/b1.
    """
    im_i = im_i_ref[0]                 # (TI, C)       natural layout, i-block rows
    im_j = im_j_ref[0]                 # (HW//P, P*C)  lane-packed, all j positions

    # g_mlp.0 (+ fused projection), f32 path (small; keeps layer-1 numerics exact).
    a_packed = (jnp.dot(im_j, w1a_bd_ref[...], preferred_element_type=jnp.float32)
                + b1_t_ref[...])                                        # (HW//P, 128)
    c_tiled = jnp.dot(im_i, w1b_t_ref[...],
                      preferred_element_type=jnp.float32)               # (TI, 128)

    # All pairs of this i-block: row (i, p), lane group m  <->  pair (i, j = P*p + m).
    h1 = jnp.maximum(c_tiled[:, None, :] + a_packed[None, :, :], 0.0)   # (TI, HW//P, 128)
    h1 = h1.reshape(-1, a_packed.shape[-1])                             # (TI*HW//P, 128)

    # Dominant matmuls: bf16 (or f32) MXU operands, f32 accumulation.
    cd = w2_bd_ref.dtype
    h2 = jnp.maximum(
        jnp.dot(h1.astype(cd), w2_bd_ref[...],
                preferred_element_type=jnp.float32) + b2_t_ref[...], 0.0)
    h3 = jnp.maximum(
        jnp.dot(h2.astype(cd), w3_bd_ref[...],
                preferred_element_type=jnp.float32) + b3_t_ref[...], 0.0)

    # Lane-dense (1, 128) partial sum; lane-group fold happens in the wrapper.
    out_ref[0] = jnp.sum(h3, axis=0, keepdims=True)


def rn_encoder_forward(im, packed):
    """im: (B, C, H, W) float32 (NCHW, like PyTorch). Returns (B, C // 2)."""
    B, C, H, W = im.shape
    Cp = C // 2
    HW = H * W
    assert 128 % Cp == 0, "lane packing assumes Cp divides 128"
    P = 128 // Cp
    assert HW % P == 0, "HW must be divisible by the lane-packing factor"

    TI = _choose_i_tile(HW, P)         # i rows per grid step (VMEM-bounded)
    NI = HW // TI

    # Pure layout ops (no wrapper matmul: projection is fused into the kernel).
    im_nat = jnp.transpose(im, (0, 2, 3, 1)).reshape(B, HW, C).astype(jnp.float32)
    im_pk = im_nat.reshape(B, HW // P, P * C)          # lane-packed view (pure reshape)

    operands = (im_nat, im_pk,
                packed["w1a_bd"], packed["w1b_t"], packed["b1_t"],
                packed["w2_bd"], packed["b2_t"],
                packed["w3_bd"], packed["b3_t"])

    # Advisory cost for XLA's scheduler (useful FLOPs, not padded block-diag FLOPs).
    flops = int(B) * HW * HW * 2 * Cp * (C + 2 * Cp)
    bytes_accessed = sum(int(o.size) * o.dtype.itemsize for o in operands) + B * NI * 128 * 4
    cost = pl.CostEstimate(flops=flops, transcendentals=0,
                           bytes_accessed=int(bytes_accessed))

    full = lambda b, i: (0, 0)

    out = pl.pallas_call(
        _rn_pair_kernel,
        out_shape=jax.ShapeDtypeStruct((B * NI, 1, 128), jnp.float32),
        grid_spec=pltpu.PrefetchScalarGridSpec(
            num_scalar_prefetch=0,
            grid=(B, NI),
            in_specs=[
                pl.BlockSpec((1, TI, C), lambda b, i: (b, i, 0)),          # im, natural (i-block)
                pl.BlockSpec((1, HW // P, P * C), lambda b, i: (b, 0, 0)),  # im, lane-packed (all j)
                pl.BlockSpec((P * C, P * Cp), full),    # (proj @ w1a) block-diag, f32
                pl.BlockSpec((C, P * Cp), full),        # (proj @ w1b) lane-tiled,  f32
                pl.BlockSpec((1, P * Cp), full),        # fused layer-1 bias, tiled
                pl.BlockSpec((P * Cp, P * Cp), full),   # g_mlp.2 weight, block-diag (compute dtype)
                pl.BlockSpec((1, P * Cp), full),        # g_mlp.2 bias, tiled (f32)
                pl.BlockSpec((P * Cp, P * Cp), full),   # g_mlp.4 weight, block-diag (compute dtype)
                pl.BlockSpec((1, P * Cp), full),        # g_mlp.4 bias, tiled (f32)
            ],
            out_specs=pl.BlockSpec((1, 1, 128), lambda b, i: (b * NI + i, 0, 0)),
        ),
        compiler_params=pltpu.CompilerParams(
            dimension_semantics=("parallel", "parallel")),
        cost_estimate=cost,
    )(*operands)

    # Fold i-blocks and the P lane groups back to Cp features (tiny wrapper sum).
    return out.reshape(B, NI * P, Cp).sum(axis=1)


def reference_forward(im, params):
    """Pure-JAX f32 transcription of the PyTorch forward (eval mode)."""
    B, C, H, W = im.shape
    Cp = C // 2
    HW = H * W
    x = jnp.einsum("bchw,co->bhwo", im, params["wp"]) + params["bp"].reshape(Cp)
    x_flat = x.reshape(B, HW, Cp)
    x_i = jnp.broadcast_to(x_flat[:, None, :, :], (B, HW, HW, Cp))  # [b,i,j] = x[b,j]
    x_j = jnp.broadcast_to(x_flat[:, :, None, :], (B, HW, HW, Cp))  # [b,i,j] = x[b,i]
    x_full = jnp.concatenate([x_i, x_j], axis=-1).reshape(B * HW * HW, C)
    w1 = jnp.concatenate([params["w1a"], params["w1b"]], axis=0)    # (C, Cp)
    g = jnp.maximum(x_full @ w1 + params["b1"], 0.0)
    g = jnp.maximum(g @ params["w2"] + params["b2"], 0.0)
    g = jnp.maximum(g @ params["w3"] + params["b3"], 0.0)
    return g.reshape(B, HW * HW, Cp).sum(axis=1)


if __name__ == "__main__":
    # input_feat_dim = 32  ->  out_dim = 16
    B, C, H, W = 2, 32, 8, 8
    Cp = C // 2

    key = jax.random.PRNGKey(0)
    keys = jax.random.split(key, 10)

    def uinit(k, shape, fan_in):
        bound = 1.0 / jnp.sqrt(float(fan_in))
        return jax.random.uniform(k, shape, jnp.float32, -bound, bound)

    params = {
        "wp":  uinit(keys[0], (C, Cp), C),    # Conv2d(C, C//2, 1) weight, (in, out)
        "bp":  uinit(keys[1], (1, Cp), C),
        "w1a": uinit(keys[2], (Cp, Cp), C),   # Linear(C, C//2) rows for the x[:, j] half
        "w1b": uinit(keys[3], (Cp, Cp), C),   # Linear(C, C//2) rows for the x[:, i] half
        "b1":  uinit(keys[4], (1, Cp), C),
        "w2":  uinit(keys[5], (Cp, Cp), Cp),
        "b2":  uinit(keys[6], (1, Cp), Cp),
        "w3":  uinit(keys[7], (Cp, Cp), Cp),
        "b3":  uinit(keys[8], (1, Cp), Cp),
    }
    im = jax.random.normal(keys[9], (B, C, H, W), jnp.float32)

    ref = jax.block_until_ready(reference_forward(im, params))

    # One-time weight packing (hoisted out of the per-forward call path).
    packed_f32 = pack_rn_params(params, compute_dtype=jnp.float32)
    packed_bf16 = pack_rn_params(params, compute_dtype=jnp.bfloat16)

    fwd = jax.jit(rn_encoder_forward)

    def rel_err(a, b):
        return jnp.max(jnp.abs(a - b)) / (jnp.max(jnp.abs(b)) + 1e-6)

    # Structural correctness: f32 compute path vs. f32 reference, tight tolerance.
    out_f32 = jax.block_until_ready(fwd(im, packed_f32))
    assert out_f32.shape == (B, Cp), out_f32.shape
    assert rel_err(out_f32, ref) < 1e-3, rel_err(out_f32, ref)

    # Performance path: bf16 MXU operands (f32 accumulation), bf16-appropriate tolerance.
    out_bf16 = jax.block_until_ready(fwd(im, packed_bf16))
    assert out_bf16.shape == (B, Cp), out_bf16.shape
    assert rel_err(out_bf16, ref) < 2e-2, rel_err(out_bf16, ref)

    print("KERNEL_OK")
</pallas_src>

<mosaic_0001>
module attributes {stable_mosaic.version = 11 : i64} {
  func.func @_rn_pair_kernel(%arg0: i32, %arg1: i32, %arg2: memref<1x64x32xf32, #tpu.memory_space<vmem>>, %arg3: memref<1x8x256xf32, #tpu.memory_space<vmem>>, %arg4: memref<256x128xf32, #tpu.memory_space<vmem>>, %arg5: memref<32x128xf32, #tpu.memory_space<vmem>>, %arg6: memref<1x128xf32, #tpu.memory_space<vmem>>, %arg7: memref<128x128xf32, #tpu.memory_space<vmem>>, %arg8: memref<1x128xf32, #tpu.memory_space<vmem>>, %arg9: memref<128x128xf32, #tpu.memory_space<vmem>>, %arg10: memref<1x128xf32, #tpu.memory_space<vmem>>, %arg11: memref<1x1x128xf32, #tpu.memory_space<vmem>>) attributes {dimension_semantics = [#tpu.dimension_semantics<parallel>, #tpu.dimension_semantics<parallel>], iteration_bounds = array<i64: 2, 1>, scalar_prefetch = 0 : i64, scratch_operands = 0 : i64, tpu.core_type = #tpu.core_type<tc>, window_params = [{transform_indices = @transform_0, window_bounds = array<i64: 1, 64, 32>}, {transform_indices = @transform_1, window_bounds = array<i64: 1, 8, 256>}, {pipeline_mode = #tpu.pipeline_mode<synchronous>, transform_indices = @transform_2, window_bounds = array<i64: 256, 128>}, {pipeline_mode = #tpu.pipeline_mode<synchronous>, transform_indices = @transform_3, window_bounds = array<i64: 32, 128>}, {pipeline_mode = #tpu.pipeline_mode<synchronous>, transform_indices = @transform_4, window_bounds = array<i64: 1, 128>}, {pipeline_mode = #tpu.pipeline_mode<synchronous>, transform_indices = @transform_5, window_bounds = array<i64: 128, 128>}, {pipeline_mode = #tpu.pipeline_mode<synchronous>, transform_indices = @transform_6, window_bounds = array<i64: 1, 128>}, {pipeline_mode = #tpu.pipeline_mode<synchronous>, transform_indices = @transform_7, window_bounds = array<i64: 128, 128>}, {pipeline_mode = #tpu.pipeline_mode<synchronous>, transform_indices = @transform_8, window_bounds = array<i64: 1, 128>}, {transform_indices = @transform_9, window_bounds = array<i64: 1, 1, 128>}]} {
    %c0 = arith.constant 0 : index
    %c0_0 = arith.constant 0 : index
    %c0_1 = arith.constant 0 : index
    %0 = vector.load %arg2[%c0, %c0_0, %c0_1] : memref<1x64x32xf32, #tpu.memory_space<vmem>>, vector<1x64x32xf32>
    %1 = vector.shape_cast %0 : vector<1x64x32xf32> to vector<64x32xf32>
    %c0_2 = arith.constant 0 : index
    %c0_3 = arith.constant 0 : index
    %c0_4 = arith.constant 0 : index
    %2 = vector.load %arg3[%c0_2, %c0_3, %c0_4] : memref<1x8x256xf32, #tpu.memory_space<vmem>>, vector<1x8x256xf32>
    %3 = vector.shape_cast %2 : vector<1x8x256xf32> to vector<8x256xf32>
    %c0_5 = arith.constant 0 : index
    %c0_6 = arith.constant 0 : index
    %4 = vector.load %arg4[%c0_5, %c0_6] : memref<256x128xf32, #tpu.memory_space<vmem>>, vector<256x128xf32>
    %cst = arith.constant dense<0.000000e+00> : vector<8x128xf32>
    %5 = tpu.matmul %3, %4, %cst {dimension_numbers = #tpu.dot_dimension_numbers<[1], [0], [0], [1], [0, 0, 1, 1], [], []>} : vector<8x256xf32>, vector<256x128xf32>, vector<8x128xf32> -> vector<8x128xf32>
    %c0_7 = arith.constant 0 : index
    %c0_8 = arith.constant 0 : index
    %6 = vector.load %arg6[%c0_7, %c0_8] : memref<1x128xf32, #tpu.memory_space<vmem>>, vector<1x128xf32>
    %7 = vector.broadcast %6 : vector<1x128xf32> to vector<8x128xf32>
    %8 = arith.addf %5, %7 : vector<8x128xf32>
    %c0_9 = arith.constant 0 : index
    %c0_10 = arith.constant 0 : index
    %9 = vector.load %arg5[%c0_9, %c0_10] : memref<32x128xf32, #tpu.memory_space<vmem>>, vector<32x128xf32>
    %cst_11 = arith.constant dense<0.000000e+00> : vector<64x128xf32>
    %10 = tpu.matmul %1, %9, %cst_11 {dimension_numbers = #tpu.dot_dimension_numbers<[1], [0], [0], [1], [0, 0, 1, 1], [], []>} : vector<64x32xf32>, vector<32x128xf32>, vector<64x128xf32> -> vector<64x128xf32>
    %11 = vector.shape_cast %10 : vector<64x128xf32> to vector<64x1x128xf32>
    %12 = vector.shape_cast %8 : vector<8x128xf32> to vector<1x8x128xf32>
    %13 = vector.broadcast %11 : vector<64x1x128xf32> to vector<64x8x128xf32>
    %14 = vector.broadcast %12 : vector<1x8x128xf32> to vector<64x8x128xf32>
    %15 = arith.addf %13, %14 : vector<64x8x128xf32>
    %cst_12 = arith.constant 0.000000e+00 : f32
    %16 = vector.broadcast %cst_12 : f32 to vector<64x8x128xf32>
    %17 = arith.maximumf %15, %16 : vector<64x8x128xf32>
    %18 = vector.shape_cast %17 : vector<64x8x128xf32> to vector<512x128xf32>
    %c0_13 = arith.constant 0 : index
    %c0_14 = arith.constant 0 : index
    %19 = vector.load %arg7[%c0_13, %c0_14] : memref<128x128xf32, #tpu.memory_space<vmem>>, vector<128x128xf32>
    %cst_15 = arith.constant dense<0.000000e+00> : vector<512x128xf32>
    %20 = tpu.matmul %18, %19, %cst_15 {dimension_numbers = #tpu.dot_dimension_numbers<[1], [0], [0], [1], [0, 0, 1, 1], [], []>} : vector<512x128xf32>, vector<128x128xf32>, vector<512x128xf32> -> vector<512x128xf32>
    %c0_16 = arith.constant 0 : index
    %c0_17 = arith.constant 0 : index
    %21 = vector.load %arg8[%c0_16, %c0_17] : memref<1x128xf32, #tpu.memory_space<vmem>>, vector<1x128xf32>
    %22 = vector.broadcast %21 : vector<1x128xf32> to vector<512x128xf32>
    %23 = arith.addf %20, %22 : vector<512x128xf32>
    %cst_18 = arith.constant 0.000000e+00 : f32
    %24 = vector.broadcast %cst_18 : f32 to vector<512x128xf32>
    %25 = arith.maximumf %23, %24 : vector<512x128xf32>
    %c0_19 = arith.constant 0 : index
    %c0_20 = arith.constant 0 : index
    %26 = vector.load %arg9[%c0_19, %c0_20] : memref<128x128xf32, #tpu.memory_space<vmem>>, vector<128x128xf32>
    %cst_21 = arith.constant dense<0.000000e+00> : vector<512x128xf32>
    %27 = tpu.matmul %25, %26, %cst_21 {dimension_numbers = #tpu.dot_dimension_numbers<[1], [0], [0], [1], [0, 0, 1, 1], [], []>} : vector<512x128xf32>, vector<128x128xf32>, vector<512x128xf32> -> vector<512x128xf32>
    %c0_22 = arith.constant 0 : index
    %c0_23 = arith.constant 0 : index
    %28 = vector.load %arg10[%c0_22, %c0_23] : memref<1x128xf32, #tpu.memory_space<vmem>>, vector<1x128xf32>
    %29 = vector.broadcast %28 : vector<1x128xf32> to vector<512x128xf32>
    %30 = arith.addf %27, %29 : vector<512x128xf32>
    %cst_24 = arith.constant 0.000000e+00 : f32
    %31 = vector.broadcast %cst_24 : f32 to vector<512x128xf32>
    %32 = arith.maximumf %30, %31 : vector<512x128xf32>
    %cst_25 = arith.constant dense<0.000000e+00> : vector<128xf32>
    %33 = vector.multi_reduction <add>, %32, %cst_25 [0] : vector<512x128xf32> to vector<128xf32>
    %34 = vector.shape_cast %33 : vector<128xf32> to vector<1x128xf32>
    %c0_26 = arith.constant 0 : index
    %c0_27 = arith.constant 0 : index
    %c0_28 = arith.constant 0 : index
    %35 = vector.load %arg11[%c0_26, %c0_27, %c0_28] : memref<1x1x128xf32, #tpu.memory_space<vmem>>, vector<1x1x128xf32>
    %36 = vector.shape_cast %35 : vector<1x1x128xf32> to vector<1x128xf32>
    %37 = vector.shape_cast %34 : vector<1x128xf32> to vector<1x1x128xf32>
    tpu.vector_store %arg11[%c0_26, %c0_27, %c0_28], %37 {strides = array<i32>} : memref<1x1x128xf32, #tpu.memory_space<vmem>>, vector<1x1x128xf32>,
    return
  }
  func.func @transform_0(%arg0: i32, %arg1: i32) -> (i32, i32, i32) {
    %c0_i32 = arith.constant 0 : i32
    %c0_i32_0 = arith.constant 0 : i32
    return %arg0, %arg1, %c0_i32 : i32, i32, i32
  }
  func.func @transform_1(%arg0: i32, %arg1: i32) -> (i32, i32, i32) {
    %c0_i32 = arith.constant 0 : i32
    %c0_i32_0 = arith.constant 0 : i32
    %c0_i32_1 = arith.constant 0 : i32
    return %arg0, %c0_i32, %c0_i32_0 : i32, i32, i32
  }
  func.func @transform_2(%arg0: i32, %arg1: i32) -> (i32, i32) {
    %c0_i32 = arith.constant 0 : i32
    %c0_i32_0 = arith.constant 0 : i32
    %c0_i32_1 = arith.constant 0 : i32
    return %c0_i32, %c0_i32_0 : i32, i32
  }
  func.func @transform_3(%arg0: i32, %arg1: i32) -> (i32, i32) {
    %c0_i32 = arith.constant 0 : i32
    %c0_i32_0 = arith.constant 0 : i32
    %c0_i32_1 = arith.constant 0 : i32
    return %c0_i32, %c0_i32_0 : i32, i32
  }
  func.func @transform_4(%arg0: i32, %arg1: i32) -> (i32, i32) {
    %c0_i32 = arith.constant 0 : i32
    %c0_i32_0 = arith.constant 0 : i32
    %c0_i32_1 = arith.constant 0 : i32
    return %c0_i32, %c0_i32_0 : i32, i32
  }
  func.func @transform_5(%arg0: i32, %arg1: i32) -> (i32, i32) {
    %c0_i32 = arith.constant 0 : i32
    %c0_i32_0 = arith.constant 0 : i32
    %c0_i32_1 = arith.constant 0 : i32
    return %c0_i32, %c0_i32_0 : i32, i32
  }
  func.func @transform_6(%arg0: i32, %arg1: i32) -> (i32, i32) {
    %c0_i32 = arith.constant 0 : i32
    %c0_i32_0 = arith.constant 0 : i32
    %c0_i32_1 = arith.constant 0 : i32
    return %c0_i32, %c0_i32_0 : i32, i32
  }
  func.func @transform_7(%arg0: i32, %arg1: i32) -> (i32, i32) {
    %c0_i32 = arith.constant 0 : i32
    %c0_i32_0 = arith.constant 0 : i32
    %c0_i32_1 = arith.constant 0 : i32
    return %c0_i32, %c0_i32_0 : i32, i32
  }
  func.func @transform_8(%arg0: i32, %arg1: i32) -> (i32, i32) {
    %c0_i32 = arith.constant 0 : i32
    %c0_i32_0 = arith.constant 0 : i32
    %c0_i32_1 = arith.constant 0 : i32
    return %c0_i32, %c0_i32_0 : i32, i32
  }
  func.func @transform_9(%arg0: i32, %arg1: i32) -> (i32, i32, i32) {
    %c1_i32 = arith.constant 1 : i32
    %0 = arith.muli %arg0, %c1_i32 : i32
    %1 = arith.addi %0, %arg1 : i32
    %c0_i32 = arith.constant 0 : i32
    %c0_i32_0 = arith.constant 0 : i32
    %c0_i32_1 = arith.constant 0 : i32
    return %1, %c0_i32, %c0_i32_0 : i32, i32, i32
  }
}

</mosaic_0001>

<bundles_post_ra>
// kernel: rn_encoder_forward.1
= control target key start
LH: loop header
LB: loop body
LE: loop exit
PB: predicated region body
PF: predicated region fallthrough
CT: control target
= control target key end

     0   :  { %14 = vsyncpa [#allocation3], 0  ;;  %s4276_s0 = inlined_call_operand.vmem [shape: f32[2,64,32], index: 0, kind: input, shape index: {}]   ;;  %s4277_s1 = inlined_call_operand.vmem [shape: f32[2,8,256], index: 1, kind: input, shape index: {}]   ;;  %s4278_s2 = inlined_call_operand.hbm [shape: f32[256,128], index: 2, kind: input, shape index: {}]   ;;  %s4279_s3 = inlined_call_operand.vmem [shape: f32[32,128], index: 3, kind: input, shape index: {}]   ;;  %s4280_s4 = inlined_call_operand.vmem [shape: f32[1,128], index: 4, kind: input, shape index: {}]   ;;  %s4281_s5 = inlined_call_operand.hbm [shape: f32[128,128], index: 5, kind: input, shape index: {}]   ;;  %s4282_s6 = inlined_call_operand.vmem [shape: f32[1,128], index: 6, kind: input, shape index: {}]   ;;  %s4283_s7 = inlined_call_operand.hbm [shape: f32[128,128], index: 7, kind: input, shape index: {}]   ;;  %s4284_s8 = inlined_call_operand.vmem [shape: f32[1,128], index: 8, kind: input, shape index: {}]   ;;  %s4285_s9 = inlined_call_operand.vmem [shape: f32[2,1,128], index: 9, kind: output, shape index: {}]  }
   0x1   :  { %15 = vsyncpa [#allocation5], 0  ;;  %s3418_s30 = smov 0   ;;  %s3420_s10 = smov 0  }
   0x2   :  { %s3422_s11 = smov 0  }
   0x3 LB: > { %s2649_s12 = sadd.s32 4294967295, %s3360_s11   ;;  %p2651_p0 = scmp.ge.s32.totalorder %s3360_s11, 1  ;;  %s3360_s11 = sphi %s3422_s11, %s21_s11   ;;  %s3356_s10 = sphi %s3420_s10, %s4297_s10   ;;  %s3352_s30 = sphi %s3418_s30, %s4296_s30  }
   0x4   : > { %p267_p1 = scmp.lt.s32.totalorder %s3360_s11, 3  ;;  %p3436_p2 = scmp.eq.s32.totalorder %s2649_s12, 0 }
   0x5   : > { %s3362_s15 = smov [#allocation4]   ;;  %s33_s18 = sadd.s32 1, %s3356_s10 }
   0x6   : > { %p3440_p3 = pnand %p2651_p0, %p267_p1  ;;  %s298_s16 = sshll.u32 %s3362_s15, 4  ;;  %s299_s16 = int_to_ptr.vmem [resolvable:$true] %s298_s16 }
   0x7   : > { %p3453_p6 = scmp.ge.s32.totalorder %s33_s18, 2  ;;  %s3363_s20 = smov [#allocation2]  }
   0x8   : > { %p3206_p4 = pneg %p3440_p3  ;;  %s279_s21 = sshll.u32 %s3363_s20, 4  ;;  %s280_s21 = int_to_ptr.vmem [resolvable:$true] %s279_s21 }
   0x9   : > { %s3263_s22 = scalar_lea.vmem %s299_s16, 2048  ;;  %p3271_p11 = scmp.lt.s32.totalorder %s299_s16, %s299_s16 }
   0xa   : > { %p3448_p5 = pnand %p3436_p2, %p3206_p4  ;;  %p3264_p8 = scmp.ne.s32.totalorder %s299_s16, %s3263_s22 }
   0xb   : > { %p3272_p12 = scmp.lt.s32.totalorder %s3263_s22, %s3263_s22 }
   0xc   : > { %p3254_p7 = pneg %p3448_p5 }
   0xd   : > { %p3273_p13 = por %p3272_p12, %p3271_p11 }
   0xe   : > { %p3266_p9 = pnand %p3264_p8, %p3254_p7 }
  0x10   : > { %p3267_p10 = pneg %p3266_p9 }
  0x12   : > { %p3274_p0 = pnand %p3273_p13, %p3267_p10 }
  0x14   : > { %3277 = shalt.err (!%p3274_p0)
}
  0x15   : > { %s3364_s23 = smov 128   ;;  %s3365_s24 = smov 8  }
  0x16   : > { %3212 = dma.hbm_to_vmem [thread:$0]  (!%p3448_p5), %s4281_s5, 2048, %s299_s16, [#allocation5], %s3364_s23, %s3364_s23, %s3365_s24  }
  0x17   : > { %s4299_s18 = smov (%p3453_p6, %s33_s18), 0  ;;  %s3289_s27 = scalar_lea.vmem %s280_s21, 4096 }
  0x18   : > { %p3290_p1 = scmp.ne.s32.totalorder %s280_s21, %s3289_s27  ;;  %p3297_p9 = scmp.lt.s32.totalorder %s280_s21, %s280_s21 }
  0x19   : > { %p3298_p10 = scmp.lt.s32.totalorder %s3289_s27, %s3289_s27 }
  0x1a   : > { %p3292_p4 = pnand %p3290_p1, %p3254_p7 }
  0x1b   : > { %p3299_p11 = por %p3298_p10, %p3297_p9 }
  0x1c   : > { %p3293_p8 = pneg %p3292_p4 }
  0x1e   : > { %p3300_p12 = pnand %p3299_p11, %p3293_p8 }
  0x20   : > { %3303 = shalt.err (!%p3300_p12)
}
  0x21   : > { %3209 = dma.hbm_to_vmem [thread:$0]  (!%p3448_p5), %s4278_s2, 4096, %s280_s21, [#allocation3], %s3364_s23, %s3364_s23, %s3365_s24  }
  0x22   : > { %s3366_s12 = smov [#allocation6]  }
  0x23   : > { %s314_s15 = sshll.u32 %s3366_s12, 4  ;;  %s315_s15 = int_to_ptr.vmem [resolvable:$true] %s314_s15 }
  0x24   : > { %s3315_s16 = scalar_lea.vmem %s315_s15, 2048  ;;  %p3323_p1 = scmp.lt.s32.totalorder %s315_s15, %s315_s15 }
  0x25   : > { %p3316_p6 = scmp.ne.s32.totalorder %s315_s15, %s3315_s16  ;;  %p3324_p4 = scmp.lt.s32.totalorder %s3315_s16, %s3315_s16 }
  0x27   : > { %p3318_p13 = pnand %p3316_p6, %p3254_p7  ;;  %p3325_p8 = por %p3324_p4, %p3323_p1 }
  0x29   : > { %p3319_p0 = pneg %p3318_p13 }
  0x2b   : > { %p3326_p9 = pnand %p3325_p8, %p3319_p0 }
  0x2d   : > { %3329 = shalt.err (!%p3326_p9)
}
  0x2e   : > { %3215 = dma.hbm_to_vmem [thread:$0]  (!%p3448_p5), %s4283_s7, 2048, %s315_s15, [#allocation5], %s3364_s23, %s3364_s23, %s3365_s24  }
  0x2f   : > { %354 = sbr.rel (%p3440_p3) target bundleno = 832 (0x340), region = 56 }
  0x34   : > { %3343 = dma.done.wait (%p3436_p2), [#allocation3], 4096  }
  0x35   : > { %3345 = vsyncadd (%p3436_p2), [#allocation3], 4294963200 }
  0x36   : > { %3347 = dma.done.wait (%p3436_p2), [#allocation5], 4096  }
  0x37   : > { %3349 = vsyncadd (%p3436_p2), [#allocation5], 4294963200  ;;  %p407_p7 = scmp.lt.s32.totalorder %s3352_s30, 1  ;;  %v467_v0 = vld [vmem:[#allocation2 + $0xf8] sm:$0xff]  ;;  %v466_v2 = vld [vmem:[#allocation2 + $0xf0] sm:$0xff]  ;;  %vm549_vm0 = vcmask 261120  }
  0x38   : > { %v451_v1 = vld [vmem:[#allocation2 + $0x78] sm:$0xff]  ;;  %2679 = vmatprep.subr.mxu0 %v467_v0  ;;  %v450_v3 = vld [vmem:[#allocation2 + $0x70] sm:$0xff]  ;;  %v465_v5 = vld [vmem:[#allocation2 + $0xe8] sm:$0xff]  ;;  %v3367_v62 = vmov 1966171168   ;;  %v691_v0 = vlaneseq }
  0x39   : > { %s4301_s30 = smov (!%p407_p7, %s3352_s30), 1  ;;  %v548_v4 = vld [vmem:[%s4279_s3 + $0x18] sm:$0xff]  ;;  %2680 = vmatpush3.msra.mxu0 %v451_v1  ;;  %v547_v6 = vld [vmem:[%s4279_s3 + $0x10] sm:$0xff]  ;;  %v449_v7 = vld [vmem:[#allocation2 + $0x68] sm:$0xff]  ;;  %v689_v63 = vunpack.c.l.s4 %v3367_v62 }
  0x3a   : > { %s2677_s21 = sshll.u32 %s4301_s30, 6  ;;  %2886 = vmatprep.subr.mxu1 %v548_v4  ;;  %2681 = vmatprep.subr.mxu0 %v466_v2  ;;  %v546_v8 = vld [vmem:[%s4279_s3 + $0x8] sm:$0xff]  ;;  %v464_v9 = vld [vmem:[#allocation2 + $0xe0] sm:$0xff]  ;;  %v463_v12 = vld [vmem:[#allocation2 + $0xd8] sm:$0xff]  ;;  %s2678_s12 = sshll.u32 %s4301_s30, 4 }
  0x3b   : > { %2887 = vmatpush3.msra.mxu1 %v548_v4  ;;  %2682 = vmatpush3.msra.mxu0 %v450_v3  ;;  %s3523_s27 = scalar_lea.vmem %s4276_s0, %s2677_s21  ;;  %v448_v10 = vld [vmem:[#allocation2 + $0x60] sm:$0xff]  ;;  %v447_v13 = vld [vmem:[#allocation2 + $0x58] sm:$0xff]  ;;  %v462_v15 = vld [vmem:[#allocation2 + $0xd0] sm:$0xff]  ;;  %s3537_s19 = scalar_lea.vmem %s4277_s1, %s2678_s12  ;;  %v690_v2 = vunpack.c.0.s8 %v689_v63  ;;  %v692_v3 = vshrl.u32 %v691_v0, 7 }
  0x3c   : > { %2888 = vmatprep.subr.mxu1 %v547_v6  ;;  %2683 = vmatprep.subr.mxu0 %v465_v5  ;;  %v545_v11 = vld [vmem:[%s4279_s3] sm:$0xff]  ;;  %v427_v16 = vld [vmem:[%s3523_s27 + $0x8] sm:$0xff]  ;;  %v446_v17 = vld [vmem:[#allocation2 + $0x50] sm:$0xff]  ;;  %s424_s25 = scalar_lea.vmem %s4285_s9, %s4301_s30 }
  0x3d   : > { %2889 = vmatpush3.msra.mxu1 %v547_v6  ;;  %2684 = vmatpush3.msra.mxu0 %v449_v7  ;;  %v426_v14 = vld [vmem:[%s3523_s27] sm:$0xff]  ;;  %v428_v18 = vld [vmem:[%s3523_s27 + $0x10] sm:$0xff]  ;;  %v461_v19 = vld [vmem:[#allocation2 + $0xc8] sm:$0xff]  ;;  %v3552_v5 = vsub.s32 %v690_v2, %v692_v3 }
  0x3e   : > { %2890 = vmatprep.subr.mxu1 %v546_v8  ;;  %2685 = vmatprep.subr.mxu0 %v464_v9  ;;  %v445_v20 = vld [vmem:[#allocation2 + $0x48] sm:$0xff]  ;;  %v460_v21 = vld [vmem:[#allocation2 + $0xc0] sm:$0xff]  ;;  %v429_v22 = vld [vmem:[%s3523_s27 + $0x18] sm:$0xff] }
  0x3f   : > { %2891 = vmatpush3.msra.mxu1 %v546_v8  ;;  %2686 = vmatpush3.msra.mxu0 %v448_v10  ;;  %v444_v23 = vld [vmem:[#allocation2 + $0x40] sm:$0xff]  ;;  %v459_v25 = vld [vmem:[#allocation2 + $0xb8] sm:$0xff]  ;;  %v435_v26 = vld [vmem:[%s3537_s19 + $0x8] sm:$0xff] }
  0x40   : > { %2892 = vmatprep.subr.mxu1 %v545_v11  ;;  %2687 = vmatprep.subr.mxu0 %v463_v12  ;;  %v430_v24 = vld [vmem:[%s3523_s27 + $0x20] sm:$0xff]  ;;  %v443_v27 = vld [vmem:[#allocation2 + $0x38] sm:$0xff]  ;;  %v458_v28 = vld [vmem:[#allocation2 + $0xb0] sm:$0xff] }
  0x41   : > { %2893 = vmatpush3.msra.mxu1 %v545_v11  ;;  %2688 = vmatpush3.msra.mxu0 %v447_v13  ;;  %v431_v29 = vld [vmem:[%s3523_s27 + $0x28] sm:$0xff]  ;;  %v442_v30 = vld [vmem:[#allocation2 + $0x30] sm:$0xff]  ;;  %v456_v34 = vld [vmem:[#allocation2 + $0xa0] sm:$0xff] }
  0x42   : > { %2894 = vmatprep.mubr.msk.f32.mxu1 %vm549_vm0, %v426_v14  ;;  %2689 = vmatprep.subr.mxu0 %v462_v15  ;;  %v432_v31 = vld [vmem:[%s3523_s27 + $0x30] sm:$0xff]  ;;  %v457_v32 = vld [vmem:[#allocation2 + $0xa8] sm:$0xff]  ;;  %v433_v35 = vld [vmem:[%s3523_s27 + $0x38] sm:$0xff] }
  0x43   : > { %2895 = vmatmul.mubr.msk.f32.vlgmr.msra.gmra.mxu1 %vm549_vm0, %v427_v16  ;;  %2690 = vmatpush3.msra.mxu0 %v446_v17  ;;  %v441_v33 = vld [vmem:[#allocation2 + $0x28] sm:$0xff]  ;;  %v440_v36 = vld [vmem:[#allocation2 + $0x20] sm:$0xff]  ;;  %v455_v37 = vld [vmem:[#allocation2 + $0x98] sm:$0xff] }
  0x44   : > { %2897 = vmatprep.mubr.msk.f32.mxu1 %vm549_vm0, %v428_v18  ;;  %2691 = vmatprep.subr.mxu0 %v461_v19  ;;  %v439_v38 = vld [vmem:[#allocation2 + $0x18] sm:$0xff]  ;;  %v454_v39 = vld [vmem:[#allocation2 + $0x90] sm:$0xff]  ;;  %v453_v41 = vld [vmem:[#allocation2 + $0x88] sm:$0xff]  ;;  %v3561_v18 = vsub.s32 0, %v692_v3 }
  0x45   : > { %2692 = vmatpush3.msra.mxu0 %v445_v20  ;;  %539 = vmatprep.mubr.f32.mxu0 %v435_v26  ;;  %v438_v40 = vld [vmem:[#allocation2 + $0x10] sm:$0xff]  ;;  %v437_v42 = vld [vmem:[#allocation2 + $0x8] sm:$0xff]  ;;  %v452_v43 = vld [vmem:[#allocation2 + $0x80] sm:$0xff] }
  0x46   : > { %2693 = vmatprep.subr.mxu0 %v460_v21  ;;  %v436_v44 = vld [vmem:[#allocation2] sm:$0xff]  ;;  %v1542_v46 = vld [vmem:[#allocation4 + $0x78] sm:$0xff]  ;;  %v1541_v47 = vld [vmem:[#allocation4 + $0x70] sm:$0xff] }
  0x47   : > { %2898 = vmatmul.mubr.msk.f32.gmra.mxu1 %vm549_vm0, %v429_v22  ;;  %2694 = vmatpush3.msra.mxu0 %v444_v23  ;;  %v434_v45 = vld [vmem:[%s3537_s19] sm:$0xff]  ;;  %v1540_v48 = vld [vmem:[#allocation4 + $0x68] sm:$0xff]  ;;  %v1538_v50 = vld [vmem:[#allocation4 + $0x58] sm:$0xff] }
  0x48   : > { %2900 = vmatprep.mubr.msk.f32.mxu1 %vm549_vm0, %v430_v24  ;;  %2695 = vmatprep.subr.mxu0 %v459_v25  ;;  %v1539_v49 = vld [vmem:[#allocation4 + $0x60] sm:$0xff]  ;;  %v1537_v51 = vld [vmem:[#allocation4 + $0x50] sm:$0xff]  ;;  %v1536_v52 = vld [vmem:[#allocation4 + $0x48] sm:$0xff] }
  0x49   : > { %2696 = vmatpush3.msra.mxu0 %v443_v27  ;;  %2906 = vmatprep.subr.mxu1 %v1542_v46  ;;  %v1535_v53 = vld [vmem:[#allocation4 + $0x40] sm:$0xff]  ;;  %v1534_v54 = vld [vmem:[#allocation4 + $0x38] sm:$0xff]  ;;  %v1533_v55 = vld [vmem:[#allocation4 + $0x30] sm:$0xff] }
  0x4a   : > { %2697 = vmatprep.subr.mxu0 %v458_v28  ;;  %2907 = vmatpush3.msra.mxu1 %v1542_v46  ;;  %v1532_v56 = vld [vmem:[#allocation4 + $0x28] sm:$0xff]  ;;  %v1531_v57 = vld [vmem:[#allocation4 + $0x20] sm:$0xff]  ;;  %v1530_v58 = vld [vmem:[#allocation4 + $0x18] sm:$0xff] }
  0x4b   : > { %2901 = vmatmul.mubr.msk.f32.gmra.mxu1 %vm549_vm0, %v431_v29  ;;  %2698 = vmatpush3.msra.mxu0 %v442_v30  ;;  %v1529_v59 = vld [vmem:[#allocation4 + $0x10] sm:$0xff]  ;;  %v1528_v60 = vld [vmem:[#allocation4 + $0x8] sm:$0xff]  ;;  %v1527_v61 = vld [vmem:[#allocation4] sm:$0xff] }
  0x4c   : > { %2903 = vmatprep.mubr.msk.f32.mxu1 %vm549_vm0, %v432_v31  ;;  %2699 = vmatprep.subr.mxu0 %v457_v32  ;;  %v2664_v62 = vld [vmem:[%s4280_s4] ss:$0 sm:$0xff] }
  0x4d   : > { %2700 = vmatpush3.msra.mxu0 %v441_v33  ;;  %2908 = vmatprep.subr.mxu1 %v1541_v47 }
  0x4e   : > { %2701 = vmatprep.subr.mxu0 %v456_v34  ;;  %2909 = vmatpush3.msra.mxu1 %v1541_v47 }
  0x4f   : > { %2904 = vmatmul.mubr.msk.f32.gmra.mxu1 %vm549_vm0, %v433_v35  ;;  %2702 = vmatpush3.msra.mxu0 %v440_v36 }
  0x50   : > { %2703 = vmatprep.subr.mxu0 %v455_v37  ;;  %2910 = vmatprep.subr.mxu1 %v1540_v48 }
  0x51   : > { %2704 = vmatpush3.msra.mxu0 %v439_v38  ;;  %2911 = vmatpush3.msra.mxu1 %v1540_v48 }
  0x52   : > { %2705 = vmatprep.subr.mxu0 %v454_v39  ;;  %2912 = vmatprep.subr.mxu1 %v1539_v49 }
  0x53   : > { %2706 = vmatpush3.msra.mxu0 %v438_v40  ;;  %2913 = vmatpush3.msra.mxu1 %v1539_v49 }
  0x54   : > { %2707 = vmatprep.subr.mxu0 %v453_v41  ;;  %2914 = vmatprep.subr.mxu1 %v1538_v50 }
  0x55   : > { %2708 = vmatpush3.msra.mxu0 %v437_v42  ;;  %2915 = vmatpush3.msra.mxu1 %v1538_v50 }
  0x56   : > { %2709 = vmatprep.subr.mxu0 %v452_v43  ;;  %2916 = vmatprep.subr.mxu1 %v1537_v51 }
  0x57   : > { %2710 = vmatpush3.msra.mxu0 %v436_v44  ;;  %2917 = vmatpush3.msra.mxu1 %v1537_v51 }
  0x58   : > { %540 = vmatmul.mubr.f32.vlgmr.msra.gmra.mxu0 %v434_v45  ;;  %2918 = vmatprep.subr.mxu1 %v1536_v52 }
  0x59   : > { %2919 = vmatpush3.msra.mxu1 %v1536_v52 }
  0x5a   : > { %2920 = vmatprep.subr.mxu1 %v1535_v53 }
  0x5b   : > { %2921 = vmatpush3.msra.mxu1 %v1535_v53 }
  0x5c   : > { %2922 = vmatprep.subr.mxu1 %v1534_v54 }
  0x5d   : > { %2923 = vmatpush3.msra.mxu1 %v1534_v54 }
  0x5e   : > { %2924 = vmatprep.subr.mxu1 %v1533_v55 }
  0x5f   : > { %2925 = vmatpush3.msra.mxu1 %v1533_v55 }
  0x60   : > { %2926 = vmatprep.subr.mxu1 %v1532_v56 }
  0x61   : > { %2927 = vmatpush3.msra.mxu1 %v1532_v56 }
  0x62   : > { %2928 = vmatprep.subr.mxu1 %v1531_v57 }
  0x63   : > { %2929 = vmatpush3.msra.mxu1 %v1531_v57 }
  0x64   : > { %2930 = vmatprep.subr.mxu1 %v1530_v58 }
  0x65   : > { %2931 = vmatpush3.msra.mxu1 %v1530_v58 }
  0x66   : > { %2932 = vmatprep.subr.mxu1 %v1529_v59 }
  0x67   : > { %2933 = vmatpush3.msra.mxu1 %v1529_v59 }
  0x68   : > { %2934 = vmatprep.subr.mxu1 %v1528_v60 }
  0x69   : > { %2935 = vmatpush3.msra.mxu1 %v1528_v60 }
  0x6a   : > { %2936 = vmatprep.subr.mxu1 %v1527_v61 }
  0x6b   : > { %2937 = vmatpush3.msra.mxu1 %v1527_v61 }
 0x103   : > { %v2896_v1 = vpop.f32.mrf.mxu1 }
 0x104   : > { %v736_v6 = vcombine.high %v2896_v1, %v2896_v1  ;;  %v743_v8 = vrot.slane %v2896_v1, %v3552_v5 }
 0x105   : > { %v640_v4 = vpop.f32.mrf.mxu1 }
 0x106   : > { %v687_v9 = vcombine.high %v640_v4, %v640_v4  ;;  %v750_v10 = vrot.slane %v736_v6, %v3552_v5  ;;  %v694_v11 = vrot.slane %v640_v4, %v3552_v5  ;;  %v751_v13 = vcombine.high %v743_v8, %v743_v8 }
 0x107   : > { %v2899_v7 = vpop.f32.mrf.mxu1  ;;  %v3558_v14 = vrot.slane %v743_v8, %v3552_v5 }
 0x108   : > { %v701_v15 = vrot.slane %v687_v9, %v3552_v5  ;;  %v752_v17 = vcombine.high %v750_v10, %v750_v10  ;;  %v702_v19 = vcombine.high %v694_v11, %v694_v11  ;;  %v3564_v20 = vrot.slane %v750_v10, %v3552_v5 }
 0x109   : > { %v650_v12 = vpop.f32.mrf.mxu1  ;;  %v841_v21 = vrot.slane %v2899_v7, %v3552_v5  ;;  %v3569_v24 = vrot.slane %v751_v13, %v3552_v5  ;;  %v710_v25 = vrot.slane %v694_v11, %v3552_v5  ;;  %v781_v27 = vcombine.high %v3558_v14, %v3558_v14 }
 0x10a   : > { %v785_v16 = vcombine.high %v650_v12, %v650_v12  ;;  %v792_v22 = vrot.slane %v650_v12, %v3552_v5  ;;  %v703_v28 = vcombine.high %v701_v15, %v701_v15  ;;  %v834_v29 = vcombine.high %v2899_v7, %v2899_v7 }
 0x10b   : > { %v2902_v23 = vpop.f32.mrf.mxu1  ;;  %v3576_v31 = vrot.slane %v752_v17, %v3552_v5  ;;  %v1114_v32 = vrot.slane %v3558_v14, %v3561_v18  ;;  %v3581_v33 = vrot.slane %v701_v15, %v3552_v5  ;;  %v724_v34 = vrot.slane %v702_v19, %v3552_v5 }
 0x10c   : > { %v932_v26 = vcombine.high %v2902_v23, %v2902_v23  ;;  %v799_v30 = vrot.slane %v785_v16, %v3552_v5  ;;  %v782_v36 = vcombine.high %v3564_v20, %v3564_v20  ;;  %v849_v37 = vcombine.high %v841_v21, %v841_v21 }
 0x10d   : > { %v800_v38 = vcombine.high %v792_v22, %v792_v22  ;;  %v939_v39 = vrot.slane %v2902_v23, %v3552_v5  ;;  %v783_v40 = vcombine.high %v3569_v24, %v3569_v24  ;;  %v732_v41 = vcombine.high %v710_v25, %v710_v25  ;;  %v660_v48 = vpop.f32.mrf.mxu1 }
 0x10e   : > { %v3590_v42 = vrot.slane %v841_v21, %v3552_v5  ;;  %v946_v43 = vrot.slane %v932_v26, %v3552_v5  ;;  %v3594_v44 = vrot.slane %v703_v28, %v3552_v5  ;;  %v1082_v45 = vrot.slane %v710_v25, %v3561_v18 }
 0x10f   : > { %v3598_v46 = vrot.slane %v834_v29, %v3552_v5  ;;  %v801_v47 = vcombine.high %v799_v30, %v799_v30  ;;  %v733_v49 = vcombine.high %v3581_v33, %v3581_v33  ;;  %v734_v50 = vcombine.high %v724_v34, %v724_v34  ;;  %v2905_v1 = vpop.f32.mrf.mxu1 }
 0x110   : > { %v1086_v51 = vrot.slane %v724_v34, %v3561_v18  ;;  %v3604_v52 = vrot.slane %v792_v22, %v3552_v5  ;;  %v3607_v54 = vrot.slane %v849_v37, %v3552_v5  ;;  %v3610_v55 = vrot.slane %v799_v30, %v3552_v5  ;;  %v2014_v34 = vld [vmem:[#allocation6 + $0x78] sm:$0xff] }
 0x111   : > { %v3613_v56 = vrot.slane %v800_v38, %v3552_v5  ;;  %v947_v57 = vcombine.high %v939_v39, %v939_v39  ;;  %v948_v59 = vcombine.high %v946_v43, %v946_v43  ;;  %v3618_v60 = vrot.slane %v939_v39, %v3552_v5  ;;  %v670_v19 = vpop.f32.mrf.mxu1  ;;  %3034 = vmatprep.subr.mxu0 %v2014_v34 }
 0x112   : > { %v883_v61 = vcombine.high %v660_v48, %v660_v48  ;;  %v3626_v0 = vrot.slane %v801_v47, %v3552_v5  ;;  %v1090_v3 = vrot.slane %v732_v41, %v3561_v18  ;;  %v830_v4 = vcombine.high %v3604_v52, %v3604_v52  ;;  %v3666_v41 = vld [vmem:[#allocation6 + $0x70] sm:$0xff]  ;;  %3162 = vmatprep.subr.mxu1 %v2014_v34 }
 0x113   : > { %v1146_v6 = vrot.slane %v3604_v52, %v3561_v18  ;;  %v3634_v7 = vrot.slane %v946_v43, %v3552_v5  ;;  %v890_v8 = vrot.slane %v660_v48, %v3552_v5  ;;  %v831_v9 = vcombine.high %v3610_v55, %v3610_v55  ;;  %3035 = vmatpush3.msra.mxu0 %v2014_v34 }
 0x114   : > { %v832_v10 = vcombine.high %v3613_v56, %v3613_v56  ;;  %v3642_v11 = vrot.slane %v947_v57, %v3552_v5  ;;  %v3647_v13 = vrot.slane %v948_v59, %v3552_v5  ;;  %v977_v15 = vcombine.high %v3618_v60, %v3618_v60  ;;  %v3675_v57 = vld [vmem:[#allocation6 + $0x68] sm:$0xff]  ;;  %3036 = vmatprep.subr.mxu0 %v3666_v41 }
 0x115   : > { %v897_v16 = vrot.slane %v883_v61, %v3552_v5  ;;  %v1094_v17 = vrot.slane %v734_v50, %v3561_v18  ;;  %v1098_v25 = vrot.slane %v3581_v33, %v3561_v18  ;;  %v978_v26 = vcombine.high %v3634_v7, %v3634_v7  ;;  %3037 = vmatpush3.msra.mxu0 %v3666_v41 }
 0x116   : > { %v1242_v28 = vrot.slane %v3618_v60, %v3561_v18  ;;  %v898_v29 = vcombine.high %v890_v8, %v890_v8  ;;  %v1030_v30 = vcombine.high %v2905_v1, %v2905_v1  ;;  %v1037_v37 = vrot.slane %v2905_v1, %v3552_v5  ;;  %3038 = vmatprep.subr.mxu0 %v3675_v57 }
 0x117   : > { %v981_v33 = vcombine.high %v670_v19, %v670_v19  ;;  %v735_v47 = vcombine.high %v3594_v44, %v3594_v44  ;;  %v899_v48 = vcombine.high %v897_v16, %v897_v16  ;;  %v3678_v59 = vrot.slane %v897_v16, %v3552_v5  ;;  %3039 = vmatpush3.msra.mxu0 %v3675_v57 }
 0x118   : > { %v2711_v35 = vpop.f32.mrf.mxu0  ;;  %v3681_v61 = vrot.slane %v898_v29, %v3552_v5  ;;  %v1045_v1 = vcombine.high %v1037_v37, %v1037_v37  ;;  %v1126_v14 = vrot.slane %v783_v40, %v3561_v18  ;;  %v1162_v52 = vrot.slane %v3610_v55, %v3561_v18 }
 0x119   : > { %v1110_v16 = vrot.slane %v735_v47, %v3561_v18 }
 0x11a   : > { %v2712_v53 = vpop.f32.mrf.mxu0  ;;  %v930_v29 = vcombine.high %v3681_v61, %v3681_v61 }
 0x11b   : > { %v2713_v2 = vadd.f32 %v2712_v53, %v2711_v35  ;;  %v3663_v35 = vrot.slane %v890_v8, %v3552_v5  ;;  %v1106_v53 = vrot.slane %v733_v49, %v3561_v18  ;;  %v988_v49 = vrot.slane %v670_v19, %v3552_v5 }
 0x11c   : > { %v3702_v19 = vrot.slane %v1037_v37, %v3552_v5 }
 0x11d   : > { %v3644_v12 = vadd.f32 %v2713_v2, %v2664_v62  ;;  %v3684_v62 = vrot.slane %v1030_v30, %v3552_v5  ;;  %v928_v2 = vcombine.high %v3663_v35, %v3663_v35 }
 0x11f   : > { %v1400_v21 = vadd.f32 %v1086_v51, %v3644_v12  ;;  %v1399_v22 = vadd.f32 %v1082_v45, %v3644_v12  ;;  %v1401_v23 = vadd.f32 %v1090_v3, %v3644_v12  ;;  %v1402_v43 = vadd.f32 %v1094_v17, %v3644_v12  ;;  %v3696_v17 = vld [vmem:[#allocation6 + $0x60] sm:$0xff] }
 0x120   : > { %v1102_v45 = vrot.slane %v3594_v44, %v3561_v18  ;;  %v1403_v51 = vadd.f32 %v1098_v25, %v3644_v12  ;;  %v979_v44 = vcombine.high %v3642_v11, %v3642_v11  ;;  %v929_v25 = vcombine.high %v3678_v59, %v3678_v59  ;;  %3040 = vmatprep.subr.mxu0 %v3696_v17 }
 0x121   : > { %v1464_v38 = vmax.f32 %v1400_v21, 0.0  ;;  %v1463_v39 = vmax.f32 %v1399_v22, 0.0  ;;  %v1465_v50 = vmax.f32 %v1401_v23, 0.0  ;;  %v1466_v3 = vmax.f32 %v1402_v43, 0.0  ;;  %3041 = vmatpush3.msra.mxu0 %v3696_v17 }
 0x122   : > { %v1404_v8 = vadd.f32 %v1102_v45, %v3644_v12  ;;  %v3699_v21 = vrot.slane %v899_v48, %v3552_v5  ;;  %v1467_v22 = vmax.f32 %v1403_v51, 0.0  ;;  %v1405_v23 = vadd.f32 %v1106_v53, %v3644_v12 }
 0x123   : > { %2938 = vmatprep.mubr.f32.mxu1 %v1463_v39  ;;  %v1046_v30 = vcombine.high %v3684_v62, %v3684_v62  ;;  %v3717_v37 = vrot.slane %v3684_v62, %v3552_v5  ;;  %v3720_v39 = vrot.slane %v1045_v1, %v3552_v5  ;;  %v996_v43 = vcombine.high %v988_v49, %v988_v49 }
 0x124   : > { %2939 = vmatmul.mubr.f32.vlgmr.msra.gmra.mxu1 %v1464_v38  ;;  %v3713_v38 = vld [vmem:[#allocation6 + $0x58] sm:$0xff]  ;;  %v1468_v45 = vmax.f32 %v1404_v8, 0.0  ;;  %v1406_v47 = vadd.f32 %v1110_v16, %v3644_v12  ;;  %v1122_v48 = vrot.slane %v781_v27, %v3561_v18  ;;  %v1469_v53 = vmax.f32 %v1405_v23, 0.0 }
 0x125   : > { %2941 = vmatprep.mubr.f32.mxu1 %v1465_v50  ;;  %3178 = vmatpush3.msra.mxu1 %v2014_v34  ;;  %v995_v34 = vrot.slane %v981_v33, %v3552_v5  ;;  %v1118_v33 = vrot.slane %v3569_v24, %v3561_v18  ;;  %v1407_v1 = vadd.f32 %v1114_v32, %v3644_v12  ;;  %v3768_v24 = vld [vmem:[#allocation6 + $0x48] sm:$0xff] }
 0x126   : > { %3042 = vmatprep.subr.mxu0 %v3713_v38  ;;  %3163 = vmatprep.subr.mxu1 %v3666_v41  ;;  %v3744_v8 = vrot.slane %v988_v49, %v3552_v5  ;;  %v1130_v32 = vrot.slane %v3564_v20, %v3561_v18  ;;  %v1134_v49 = vrot.slane %v3576_v31, %v3561_v18  ;;  %v1470_v23 = vmax.f32 %v1406_v47, 0.0 }
 0x127   : > { %v997_v27 = vcombine.high %v995_v34, %v995_v34  ;;  %v3747_v16 = vrot.slane %v995_v34, %v3552_v5  ;;  %3043 = vmatpush3.msra.mxu0 %v3713_v38  ;;  %v1408_v34 = vadd.f32 %v1118_v33, %v3644_v12  ;;  %v1471_v47 = vmax.f32 %v1407_v1, 0.0  ;;  %3179 = vmatpush3.msra.mxu1 %v3666_v41  ;;  %v3787_v1 = vld [vmem:[#allocation6 + $0x40] sm:$0xff] }
 0x128   : > { %2942 = vmatmul.mubr.f32.gmra.mxu1 %v1466_v3  ;;  %v3740_v3 = vld [vmem:[#allocation6 + $0x50] sm:$0xff]  ;;  %v784_v33 = vcombine.high %v3576_v31, %v3576_v31  ;;  %v1274_v58 = vrot.slane %v3744_v8, %v3561_v18  ;;  %v1410_v41 = vadd.f32 %v1126_v14, %v3644_v12  ;;  %3164 = vmatprep.subr.mxu1 %v3675_v57 }
 0x129   : > { %2944 = vmatprep.mubr.f32.mxu1 %v1467_v22  ;;  %v3751_v22 = vrot.slane %v996_v43, %v3552_v5  ;;  %v1138_v43 = vrot.slane %v782_v36, %v3561_v18  ;;  %3044 = vmatprep.subr.mxu0 %v3740_v3  ;;  %v3779_v20 = vrot.slane %v997_v27, %v3552_v5  ;;  %v1472_v63 = vmax.f32 %v1408_v34, 0.0  ;;  %v3812_v34 = vld [vmem:[#allocation6 + $0x38] sm:$0xff] }
 0x12a   : > { %3045 = vmatpush3.msra.mxu0 %v3740_v3  ;;  %v1026_v36 = vcombine.high %v3744_v8, %v3744_v8  ;;  %v1411_v27 = vadd.f32 %v1130_v32, %v3644_v12  ;;  %v3803_v14 = vadd.f32 %v1146_v6, %v3644_v12  ;;  %v1214_v32 = vrot.slane %v3681_v61, %v3561_v18 }
 0x12b   : > { %v1028_v31 = vcombine.high %v3751_v22, %v3751_v22  ;;  %3046 = vmatprep.subr.mxu0 %v3768_v24  ;;  %v1413_v50 = vadd.f32 %v1138_v43, %v3644_v12  ;;  %v1226_v6 = vrot.slane %v3678_v59, %v3561_v18  ;;  %v1230_v43 = vrot.slane %v3699_v21, %v3561_v18 }
 0x12c   : > { %2945 = vmatmul.mubr.f32.gmra.mxu1 %v1468_v45  ;;  %v1409_v45 = vadd.f32 %v1122_v48, %v3644_v12  ;;  %v1027_v48 = vcombine.high %v3747_v16, %v3747_v16  ;;  %3047 = vmatpush3.msra.mxu0 %v3768_v24 }
 0x12d   : > { %2947 = vmatprep.mubr.f32.mxu1 %v1469_v53  ;;  %v1412_v53 = vadd.f32 %v1134_v49, %v3644_v12  ;;  %v1218_v49 = vrot.slane %v928_v2, %v3561_v18  ;;  %3048 = vmatprep.subr.mxu0 %v3787_v1  ;;  %v1234_v2 = vrot.slane %v929_v25, %v3561_v18  ;;  %v1477_v60 = vmax.f32 %v1413_v50, 0.0 }
 0x12e   : > { %v1473_v40 = vmax.f32 %v1409_v45, 0.0  ;;  %v1222_v45 = vrot.slane %v930_v29, %v3561_v18  ;;  %3049 = vmatpush3.msra.mxu0 %v3787_v1  ;;  %v3835_v29 = vld [vmem:[#allocation6 + $0x30] sm:$0xff]  ;;  %v3841_v59 = vadd.f32 %v1226_v6, %v3644_v12  ;;  %v3844_v25 = vadd.f32 %v1230_v43, %v3644_v12  ;;  %3180 = vmatpush3.msra.mxu1 %v3675_v57 }
 0x12f   : > { %v3832_v61 = vadd.f32 %v1218_v49, %v3644_v12  ;;  %3050 = vmatprep.subr.mxu0 %v3812_v34  ;;  %v1158_v49 = vrot.slane %v832_v10, %v3561_v18  ;;  %v1476_v6 = vmax.f32 %v1412_v53, 0.0  ;;  %v3875_v57 = vadd.f32 %v1242_v28, %v3644_v12  ;;  %3165 = vmatprep.subr.mxu1 %v3696_v17 }
 0x130   : > { %2948 = vmatmul.mubr.f32.gmra.mxu1 %v1470_v23  ;;  %v1142_v23 = vrot.slane %v784_v33, %v3561_v18  ;;  %v3829_v33 = vadd.f32 %v1214_v32, %v3644_v12  ;;  %v3838_v51 = vadd.f32 %v1222_v45, %v3644_v12  ;;  %v1154_v32 = vrot.slane %v830_v4, %v3561_v18 }
 0x131   : > { %2950 = vmatprep.mubr.f32.mxu1 %v1471_v47  ;;  %v1474_v47 = vmax.f32 %v1410_v41, 0.0  ;;  %v1475_v41 = vmax.f32 %v1411_v27, 0.0  ;;  %v931_v45 = vcombine.high %v3699_v21, %v3699_v21  ;;  %3051 = vmatpush3.msra.mxu0 %v3812_v34  ;;  %v1166_v4 = vrot.slane %v3626_v0, %v3561_v18 }
 0x132   : > { %v1414_v27 = vadd.f32 %v1142_v23, %v3644_v12  ;;  %3052 = vmatprep.subr.mxu0 %v3835_v29  ;;  %v1246_v21 = vrot.slane %v3642_v11, %v3561_v18  ;;  %v1250_v53 = vrot.slane %v977_v15, %v3561_v18  ;;  %v1254_v23 = vrot.slane %v979_v44, %v3561_v18 }
 0x133   : > { %v1238_v10 = vrot.slane %v931_v45, %v3561_v18  ;;  %v1258_v43 = vrot.slane %v3634_v7, %v3561_v18  ;;  %v1262_v28 = vrot.slane %v3647_v13, %v3561_v18  ;;  %3053 = vmatpush3.msra.mxu0 %v3835_v29  ;;  %v1479_v45 = vmax.f32 %v3803_v14, 0.0  ;;  %3181 = vmatpush3.msra.mxu1 %v3696_v17 }
 0x134   : > { %2951 = vmatmul.mubr.f32.gmra.mxu1 %v1472_v63  ;;  %v1150_v63 = vrot.slane %v3613_v56, %v3561_v18  ;;  %v3868_v56 = vld [vmem:[#allocation6 + $0x28] sm:$0xff]  ;;  %v3900_v11 = vadd.f32 %v1246_v21, %v3644_v12  ;;  %v3903_v44 = vadd.f32 %v1250_v53, %v3644_v12  ;;  %v3910_v7 = vadd.f32 %v1254_v23, %v3644_v12 }
 0x135   : > { %2953 = vmatprep.mubr.f32.mxu1 %v1473_v40  ;;  %v3847_v40 = vadd.f32 %v1234_v2, %v3644_v12  ;;  %v1266_v2 = vrot.slane %v978_v26, %v3561_v18  ;;  %v3897_v15 = vadd.f32 %v1238_v10, %v3644_v12  ;;  %3054 = vmatprep.subr.mxu0 %v3868_v56  ;;  %v1478_v53 = vmax.f32 %v1414_v27, 0.0 }
 0x136   : > { %v3913_v26 = vadd.f32 %v1258_v43, %v3644_v12  ;;  %v3916_v50 = vadd.f32 %v1262_v28, %v3644_v12  ;;  %v1416_v10 = vadd.f32 %v1150_v63, %v3644_v12  ;;  %v980_v21 = vcombine.high %v3647_v13, %v3647_v13  ;;  %3055 = vmatpush3.msra.mxu0 %v3868_v56 }
 0x137   : > { %v1417_v23 = vadd.f32 %v1154_v32, %v3644_v12  ;;  %v1418_v43 = vadd.f32 %v1158_v49, %v3644_v12  ;;  %v833_v14 = vcombine.high %v3626_v0, %v3626_v0  ;;  %v1278_v13 = vrot.slane %v3751_v22, %v3561_v18  ;;  %3166 = vmatprep.subr.mxu1 %v3713_v38 }
 0x138   : > { %2954 = vmatmul.mubr.f32.gmra.mxu1 %v1474_v47  ;;  %v3906_v47 = vld [vmem:[#allocation6 + $0x20] sm:$0xff]  ;;  %v1270_v55 = vrot.slane %v980_v21, %v3561_v18  ;;  %v1282_v63 = vrot.slane %v1026_v36, %v3561_v18  ;;  %v1286_v17 = vrot.slane %v1028_v31, %v3561_v18  ;;  %v1294_v32 = vrot.slane %v3779_v20, %v3561_v18 }
 0x139   : > { %2956 = vmatprep.mubr.f32.mxu1 %v1475_v41  ;;  %v3919_v41 = vadd.f32 %v1266_v2, %v3644_v12  ;;  %3056 = vmatprep.subr.mxu0 %v3906_v47  ;;  %v1298_v8 = vrot.slane %v1027_v48, %v3561_v18  ;;  %v1480_v36 = vmax.f32 %v1416_v10, 0.0  ;;  %v3966_v27 = vadd.f32 %v1278_v13, %v3644_v12 }
 0x13a   : > { %3057 = vmatpush3.msra.mxu0 %v3906_v47  ;;  %v3963_v49 = vadd.f32 %v1270_v55, %v3644_v12  ;;  %v3969_v22 = vadd.f32 %v1282_v63, %v3644_v12  ;;  %v3973_v31 = vadd.f32 %v1286_v17, %v3644_v12  ;;  %3182 = vmatpush3.msra.mxu1 %v3713_v38  ;;  %v1482_v21 = vmax.f32 %v1418_v43, 0.0 }
 0x13b   : > { %v3982_v48 = vadd.f32 %v1298_v8, %v3644_v12  ;;  %v1074_v2 = vrot.slane %v1046_v30, %v3552_v5  ;;  %v1029_v10 = vcombine.high %v3779_v20, %v3779_v20  ;;  %3167 = vmatprep.subr.mxu1 %v3740_v3  ;;  %v1420_v38 = vadd.f32 %v1166_v4, %v3644_v12 }
 0x13c   : > { %2957 = vmatmul.mubr.f32.gmra.mxu1 %v1476_v6  ;;  %v1170_v6 = vrot.slane %v831_v9, %v3561_v18  ;;  %v3941_v9 = vadd.f32 %v1274_v58, %v3644_v12  ;;  %v1290_v58 = vrot.slane %v3747_v16, %v3561_v18  ;;  %v3979_v16 = vadd.f32 %v1294_v32, %v3644_v12 }
 0x13d   : > { %2959 = vmatprep.mubr.f32.mxu1 %v1477_v60  ;;  %v1481_v60 = vmax.f32 %v1417_v23, 0.0  ;;  %v1174_v62 = vrot.slane %v833_v14, %v3561_v18  ;;  %v1302_v30 = vrot.slane %v1029_v10, %v3561_v18  ;;  %v4290_v20 = vrot.slane %v3702_v19, %v3561_v18  ;;  %3183 = vmatpush3.msra.mxu1 %v3740_v3 }
 0x13e   : > { %v3976_v28 = vadd.f32 %v1290_v58, %v3644_v12  ;;  %v1310_v23 = vrot.slane %v3720_v39, %v3561_v18  ;;  %v4291_v0 = vcombine.high %v3702_v19, %v3702_v19  ;;  %v1322_v14 = vrot.slane %v3717_v37, %v3561_v18  ;;  %3168 = vmatprep.subr.mxu1 %v3768_v24 }
 0x13f   : > { %v1326_v55 = vrot.slane %v1074_v2, %v3561_v18  ;;  %v4293_v13 = vcombine.high %v3717_v37, %v3717_v37  ;;  %v4025_v19 = vadd.f32 %v1302_v30, %v3644_v12  ;;  %3184 = vmatpush3.msra.mxu1 %v3768_v24  ;;  %v881_v10 = vcombine.high %v3607_v54, %v3607_v54 }
 0x140   : > { %2960 = vmatmul.mubr.f32.gmra.mxu1 %v1478_v53  ;;  %v1421_v53 = vadd.f32 %v1170_v6, %v3644_v12  ;;  %v1314_v4 = vrot.slane %v4291_v0, %v3561_v18  ;;  %v4292_v6 = vcombine.high %v3720_v39, %v3720_v39  ;;  %v4028_v58 = vadd.f32 %v1310_v23, %v3644_v12 }
 0x141   : > { %2962 = vmatprep.mubr.f32.mxu1 %v1479_v45  ;;  %v1419_v45 = vadd.f32 %v1162_v52, %v3644_v12  ;;  %v4004_v52 = vadd.f32 %v4290_v20, %v3644_v12  ;;  %v1330_v63 = vrot.slane %v4293_v13, %v3561_v18  ;;  %v4038_v37 = vadd.f32 %v1322_v14, %v3644_v12 }
 0x142   : > { %v1318_v43 = vrot.slane %v4292_v6, %v3561_v18  ;;  %v4031_v39 = vadd.f32 %v1314_v4, %v3644_v12  ;;  %v4041_v3 = vadd.f32 %v1326_v55, %v3644_v12  ;;  %v1422_v30 = vadd.f32 %v1174_v62, %v3644_v12  ;;  %3169 = vmatprep.subr.mxu1 %v3787_v1 }
 0x143   : > { %v1483_v17 = vmax.f32 %v1419_v45, 0.0  ;;  %v4044_v8 = vadd.f32 %v1330_v63, %v3644_v12  ;;  %v1078_v45 = vcombine.high %v1074_v2, %v1074_v2  ;;  %v1182_v20 = vrot.slane %v3607_v54, %v3561_v18  ;;  %3185 = vmatpush3.msra.mxu1 %v3787_v1 }
 0x144   : > { %2963 = vmatmul.mubr.f32.gmra.mxu1 %v1480_v36  ;;  %v4035_v32 = vadd.f32 %v1318_v43, %v3644_v12  ;;  %v850_v36 = vcombine.high %v3598_v46, %v3598_v46  ;;  %v1485_v23 = vmax.f32 %v1421_v53, 0.0  ;;  %v4295_v24 = vcombine.high %v3590_v42, %v3590_v42  ;;  %3170 = vmatprep.subr.mxu1 %v3812_v34 }
 0x145   : > { %2965 = vmatprep.mubr.f32.mxu1 %v1481_v60  ;;  %v864_v60 = vrot.slane %v3598_v46, %v3552_v5  ;;  %v4294_v46 = vrot.slane %v3590_v42, %v3561_v18  ;;  %3186 = vmatpush3.msra.mxu1 %v3812_v34  ;;  %v1486_v62 = vmax.f32 %v1422_v30, 0.0  ;;  %v1424_v4 = vadd.f32 %v1182_v20, %v3644_v12 }
 0x146   : > { %v1186_v2 = vrot.slane %v4295_v24, %v3561_v18  ;;  %v878_v53 = vrot.slane %v850_v36, %v3552_v5  ;;  %v1190_v42 = vrot.slane %v881_v10, %v3561_v18  ;;  %3171 = vmatprep.subr.mxu1 %v3835_v29  ;;  %v1496_v24 = vmax.f32 %v3829_v33, 0.0 }
 0x147   : > { %v1423_v0 = vadd.f32 %v4294_v46, %v3644_v12  ;;  %v880_v6 = vcombine.high %v864_v60, %v864_v60  ;;  %v1194_v14 = vrot.slane %v864_v60, %v3561_v18  ;;  %3187 = vmatpush3.msra.mxu1 %v3835_v29  ;;  %v1488_v5 = vmax.f32 %v1424_v4, 0.0 }
 0x148   : > { %2966 = vmatmul.mubr.f32.gmra.mxu1 %v1482_v21  ;;  %v1484_v21 = vmax.f32 %v1420_v38, 0.0  ;;  %v1334_v38 = vrot.slane %v1078_v45, %v3561_v18  ;;  %v1425_v43 = vadd.f32 %v1186_v2, %v3644_v12  ;;  %3172 = vmatprep.subr.mxu1 %v3868_v56  ;;  %v1426_v34 = vadd.f32 %v1190_v42, %v3644_v12 }
 0x149   : > { %2968 = vmatprep.mubr.f32.mxu1 %v1483_v17  ;;  %v1487_v1 = vmax.f32 %v1423_v0, 0.0  ;;  %3188 = vmatpush3.msra.mxu1 %v3868_v56  ;;  %v1198_v55 = vrot.slane %v878_v53, %v3561_v18  ;;  %v882_v13 = vcombine.high %v878_v53, %v878_v53  ;;  %v1427_v17 = vadd.f32 %v1194_v14, %v3644_v12 }
 0x14a   : > { %v4069_v54 = vadd.f32 %v1334_v38, %v3644_v12  ;;  %3173 = vmatprep.subr.mxu1 %v3906_v47  ;;  %v1489_v63 = vmax.f32 %v1425_v43, 0.0  ;;  %v1202_v36 = vrot.slane %v880_v6, %v3561_v18  ;;  %v1490_v29 = vmax.f32 %v1426_v34, 0.0  ;;  %v2002_v38 = vld [vmem:[#allocation6 + $0x18] sm:$0xff] }
 0x14b   : > { %3189 = vmatpush3.msra.mxu1 %v3906_v47  ;;  %v1428_v56 = vadd.f32 %v1198_v55, %v3644_v12  ;;  %v1206_v60 = vrot.slane %v882_v13, %v3561_v18  ;;  %v1210_v45 = vrot.slane %v3663_v35, %v3561_v18  ;;  %v1491_v10 = vmax.f32 %v1427_v17, 0.0  ;;  %3058 = vmatprep.subr.mxu0 %v2002_v38 }
 0x14c   : > { %2969 = vmatmul.mubr.f32.gmra.mxu1 %v1484_v21  ;;  %v1429_v21 = vadd.f32 %v1202_v36, %v3644_v12  ;;  %v1497_v18 = vmax.f32 %v3832_v61, 0.0  ;;  %v1498_v35 = vmax.f32 %v3838_v51, 0.0  ;;  %v1499_v2 = vmax.f32 %v3841_v59, 0.0  ;;  %3059 = vmatpush3.msra.mxu0 %v2002_v38  ;;  %v2000_v61 = vld [vmem:[#allocation6 + $0x8] sm:$0xff]  ;;  %v1999_v51 = vld [vmem:[#allocation6] sm:$0xff] }
 0x14d   : > { %2971 = vmatprep.mubr.f32.mxu1 %v1485_v23  ;;  %v1492_v30 = vmax.f32 %v1428_v56, 0.0  ;;  %v1430_v20 = vadd.f32 %v1206_v60, %v3644_v12  ;;  %v1431_v47 = vadd.f32 %v1210_v45, %v3644_v12  ;;  %v2001_v12 = vld [vmem:[#allocation6 + $0x10] sm:$0xff]  ;;  %v1500_v53 = vmax.f32 %v3844_v25, 0.0  ;;  %3174 = vmatprep.subr.mxu1 %v2002_v38 }
 0x14e   : > { %v1493_v23 = vmax.f32 %v1429_v21, 0.0  ;;  %3060 = vmatprep.subr.mxu0 %v2001_v12  ;;  %v1501_v33 = vmax.f32 %v3847_v40, 0.0  ;;  %3190 = vmatpush3.msra.mxu1 %v2002_v38  ;;  %v1502_v59 = vmax.f32 %v3897_v15, 0.0  ;;  %v1504_v25 = vmax.f32 %v3900_v11, 0.0 }
 0x14f   : > { %v1494_v46 = vmax.f32 %v1430_v20, 0.0  ;;  %v1495_v0 = vmax.f32 %v1431_v47, 0.0  ;;  %3061 = vmatpush3.msra.mxu0 %v2001_v12  ;;  %3175 = vmatprep.subr.mxu1 %v2001_v12  ;;  %v1505_v40 = vmax.f32 %v3903_v44, 0.0  ;;  %v1506_v15 = vmax.f32 %v3910_v7, 0.0 }
 0x150   : > { %2972 = vmatmul.mubr.f32.gmra.mxu1 %v1486_v62  ;;  %3062 = vmatprep.subr.mxu0 %v2000_v61  ;;  %v1503_v62 = vmax.f32 %v3875_v57, 0.0  ;;  %v1507_v4 = vmax.f32 %v3913_v26, 0.0  ;;  %v1508_v57 = vmax.f32 %v3916_v50, 0.0  ;;  %v1509_v42 = vmax.f32 %v3919_v41, 0.0 }
 0x151   : > { %2974 = vmatprep.mubr.f32.mxu1 %v1487_v1  ;;  %3063 = vmatpush3.msra.mxu0 %v2000_v61  ;;  %v1510_v11 = vmax.f32 %v3963_v49, 0.0  ;;  %v1511_v6 = vmax.f32 %v3941_v9, 0.0  ;;  %v1512_v44 = vmax.f32 %v3966_v27, 0.0  ;;  %v1513_v7 = vmax.f32 %v3969_v22, 0.0 }
 0x152   : > { %3064 = vmatprep.subr.mxu0 %v1999_v51  ;;  %3191 = vmatpush3.msra.mxu1 %v2001_v12  ;;  %v1514_v26 = vmax.f32 %v3973_v31, 0.0  ;;  %v1515_v50 = vmax.f32 %v3976_v28, 0.0  ;;  %v1516_v41 = vmax.f32 %v3979_v16, 0.0  ;;  %v1517_v49 = vmax.f32 %v3982_v48, 0.0 }
 0x153   : > { %3065 = vmatpush3.msra.mxu0 %v1999_v51  ;;  %3176 = vmatprep.subr.mxu1 %v2000_v61  ;;  %v1518_v9 = vmax.f32 %v4025_v19, 0.0  ;;  %v1519_v27 = vmax.f32 %v4004_v52, 0.0  ;;  %v1520_v22 = vmax.f32 %v4028_v58, 0.0  ;;  %v1521_v31 = vmax.f32 %v4031_v39, 0.0  ;;  %v4128_v58 = vld [vmem:[%s4282_s6] ss:$0 sm:$0xff] }
 0x154   : > { %2975 = vmatmul.mubr.f32.gmra.mxu1 %v1488_v5  ;;  %v1522_v28 = vmax.f32 %v4035_v32, 0.0  ;;  %v1523_v16 = vmax.f32 %v4038_v37, 0.0  ;;  %v1524_v48 = vmax.f32 %v4041_v3, 0.0  ;;  %v1525_v19 = vmax.f32 %v4044_v8, 0.0 }
 0x155   : > { %2977 = vmatprep.mubr.f32.mxu1 %v1489_v63  ;;  %3192 = vmatpush3.msra.mxu1 %v2000_v61  ;;  %v1526_v52 = vmax.f32 %v4069_v54, 0.0 }
 0x156   : > { %3177 = vmatprep.subr.mxu1 %v1999_v51 }
 0x157   : > { %3193 = vmatpush3.msra.mxu1 %v1999_v51 }
 0x158   : > { %2978 = vmatmul.mubr.f32.gmra.mxu1 %v1490_v29 }
 0x159   : > { %2980 = vmatprep.mubr.f32.mxu1 %v1491_v10 }
 0x15c   : > { %2981 = vmatmul.mubr.f32.gmra.mxu1 %v1492_v30 }
 0x15d   : > { %2983 = vmatprep.mubr.f32.mxu1 %v1493_v23 }
 0x160   : > { %2984 = vmatmul.mubr.f32.gmra.mxu1 %v1494_v46 }
 0x161   : > { %2986 = vmatprep.mubr.f32.mxu1 %v1495_v0 }
 0x164   : > { %2987 = vmatmul.mubr.f32.gmra.mxu1 %v1496_v24 }
 0x165   : > { %2989 = vmatprep.mubr.f32.mxu1 %v1497_v18 }
 0x168   : > { %2990 = vmatmul.mubr.f32.gmra.mxu1 %v1498_v35 }
 0x169   : > { %2992 = vmatprep.mubr.f32.mxu1 %v1499_v2 }
 0x16c   : > { %2993 = vmatmul.mubr.f32.gmra.mxu1 %v1500_v53 }
 0x16d   : > { %2995 = vmatprep.mubr.f32.mxu1 %v1501_v33 }
 0x170   : > { %2996 = vmatmul.mubr.f32.gmra.mxu1 %v1502_v59 }
 0x171   : > { %2998 = vmatprep.mubr.f32.mxu1 %v1503_v62 }
 0x174   : > { %2999 = vmatmul.mubr.f32.gmra.mxu1 %v1504_v25 }
 0x175   : > { %3001 = vmatprep.mubr.f32.mxu1 %v1505_v40 }
 0x178   : > { %3002 = vmatmul.mubr.f32.gmra.mxu1 %v1506_v15 }
 0x179   : > { %3004 = vmatprep.mubr.f32.mxu1 %v1507_v4 }
 0x17c   : > { %3005 = vmatmul.mubr.f32.gmra.mxu1 %v1508_v57 }
 0x17d   : > { %3007 = vmatprep.mubr.f32.mxu1 %v1509_v42 }
 0x180   : > { %3008 = vmatmul.mubr.f32.gmra.mxu1 %v1510_v11 }
 0x181   : > { %3010 = vmatprep.mubr.f32.mxu1 %v1511_v6 }
 0x184   : > { %3011 = vmatmul.mubr.f32.gmra.mxu1 %v1512_v44 }
 0x185   : > { %3013 = vmatprep.mubr.f32.mxu1 %v1513_v7 }
 0x188   : > { %3014 = vmatmul.mubr.f32.gmra.mxu1 %v1514_v26 }
 0x189   : > { %3016 = vmatprep.mubr.f32.mxu1 %v1515_v50 }
 0x18c   : > { %3017 = vmatmul.mubr.f32.gmra.mxu1 %v1516_v41 }
 0x18d   : > { %3019 = vmatprep.mubr.f32.mxu1 %v1517_v49 }
 0x190   : > { %3020 = vmatmul.mubr.f32.gmra.mxu1 %v1518_v9 }
 0x191   : > { %3022 = vmatprep.mubr.f32.mxu1 %v1519_v27 }
 0x194   : > { %3023 = vmatmul.mubr.f32.gmra.mxu1 %v1520_v22 }
 0x195   : > { %3025 = vmatprep.mubr.f32.mxu1 %v1521_v31 }
 0x198   : > { %3026 = vmatmul.mubr.f32.gmra.mxu1 %v1522_v28 }
 0x199   : > { %3028 = vmatprep.mubr.f32.mxu1 %v1523_v16 }
 0x19c   : > { %3029 = vmatmul.mubr.f32.gmra.mxu1 %v1524_v48 }
 0x19d   : > { %3031 = vmatprep.mubr.f32.mxu1 %v1525_v19 }
 0x1a0   : > { %3032 = vmatmul.mubr.f32.gmra.mxu1 %v1526_v52 }
 0x1e4   : > { %v2940_v39 = vpop.f32.mrf.mxu1 }
 0x1e5   : > { %v1622_v32 = vadd.f32 %v2940_v39, %v4128_v58 }
 0x1e6   : > { %v1616_v37 = vpop.f32.mrf.mxu1 }
 0x1e7   : > { %v1617_v1 = vadd.f32 %v4128_v58, %v1616_v37  ;;  %v1936_v14 = vmax.f32 %v1622_v32, 0.0 }
 0x1e8   : > { %v2943_v43 = vpop.f32.mrf.mxu1 }
 0x1e9   : > { %v1935_v3 = vmax.f32 %v1617_v1, 0.0  ;;  %v1632_v8 = vadd.f32 %v2943_v43, %v4128_v58 }
 0x1ea   : > { %v1626_v5 = vpop.f32.mrf.mxu1 }
 0x1eb   : > { %v1627_v54 = vadd.f32 %v4128_v58, %v1626_v5  ;;  %3066 = vmatprep.mubr.f32.mxu0 %v1935_v3  ;;  %v1938_v13 = vmax.f32 %v1632_v8, 0.0 }
 0x1ec   : > { %v2946_v34 = vpop.f32.mrf.mxu1  ;;  %3067 = vmatmul.mubr.f32.vlgmr.msra.gmra.mxu0 %v1936_v14 }
 0x1ed   : > { %v1937_v55 = vmax.f32 %v1627_v54, 0.0  ;;  %v1642_v63 = vadd.f32 %v2946_v34, %v4128_v58 }
 0x1ee   : > { %v1636_v17 = vpop.f32.mrf.mxu1 }
 0x1ef   : > { %v1637_v36 = vadd.f32 %v4128_v58, %v1636_v17  ;;  %3069 = vmatprep.mubr.f32.mxu0 %v1937_v55  ;;  %v1940_v60 = vmax.f32 %v1642_v63, 0.0 }
 0x1f0   : > { %v2949_v29 = vpop.f32.mrf.mxu1  ;;  %3070 = vmatmul.mubr.f32.gmra.mxu0 %v1938_v13 }
 0x1f1   : > { %v1939_v56 = vmax.f32 %v1637_v36, 0.0  ;;  %v1652_v45 = vadd.f32 %v2949_v29, %v4128_v58 }
 0x1f2   : > { %v1646_v10 = vpop.f32.mrf.mxu1 }
 0x1f3   : > { %v1647_v21 = vadd.f32 %v4128_v58, %v1646_v10  ;;  %3072 = vmatprep.mubr.f32.mxu0 %v1939_v56  ;;  %v1942_v23 = vmax.f32 %v1652_v45, 0.0 }
 0x1f4   : > { %v2952_v30 = vpop.f32.mrf.mxu1  ;;  %3073 = vmatmul.mubr.f32.gmra.mxu0 %v1940_v60 }
 0x1f5   : > { %v1941_v20 = vmax.f32 %v1647_v21, 0.0  ;;  %v1662_v47 = vadd.f32 %v2952_v30, %v4128_v58 }
 0x1f6   : > { %v1656_v46 = vpop.f32.mrf.mxu1 }
 0x1f7   : > { %v1657_v0 = vadd.f32 %v4128_v58, %v1656_v46  ;;  %3075 = vmatprep.mubr.f32.mxu0 %v1941_v20  ;;  %v1944_v35 = vmax.f32 %v1662_v47, 0.0 }
 0x1f8   : > { %v2955_v24 = vpop.f32.mrf.mxu1  ;;  %3076 = vmatmul.mubr.f32.gmra.mxu0 %v1942_v23 }
 0x1f9   : > { %v1943_v18 = vmax.f32 %v1657_v0, 0.0  ;;  %v1672_v2 = vadd.f32 %v2955_v24, %v4128_v58 }
 0x1fa   : > { %v1666_v38 = vpop.f32.mrf.mxu1 }
 0x1fb   : > { %v1667_v12 = vadd.f32 %v4128_v58, %v1666_v38  ;;  %3078 = vmatprep.mubr.f32.mxu0 %v1943_v18  ;;  %v1946_v61 = vmax.f32 %v1672_v2, 0.0 }
 0x1fc   : > { %v2958_v53 = vpop.f32.mrf.mxu1  ;;  %3079 = vmatmul.mubr.f32.gmra.mxu0 %v1944_v35 }
 0x1fd   : > { %v1945_v33 = vmax.f32 %v1667_v12, 0.0  ;;  %v1682_v51 = vadd.f32 %v2958_v53, %v4128_v58 }
 0x1fe   : > { %v1676_v59 = vpop.f32.mrf.mxu1 }
 0x1ff   : > { %v1677_v62 = vadd.f32 %v4128_v58, %v1676_v59  ;;  %3081 = vmatprep.mubr.f32.mxu0 %v1945_v33  ;;  %v1948_v15 = vmax.f32 %v1682_v51, 0.0 }
 0x200   : > { %v2961_v25 = vpop.f32.mrf.mxu1  ;;  %3082 = vmatmul.mubr.f32.gmra.mxu0 %v1946_v61 }
 0x201   : > { %v1947_v40 = vmax.f32 %v1677_v62, 0.0  ;;  %v1692_v4 = vadd.f32 %v2961_v25, %v4128_v58 }
 0x202   : > { %v1686_v57 = vpop.f32.mrf.mxu1 }
 0x203   : > { %v1687_v42 = vadd.f32 %v4128_v58, %v1686_v57  ;;  %3084 = vmatprep.mubr.f32.mxu0 %v1947_v40  ;;  %v1950_v44 = vmax.f32 %v1692_v4, 0.0 }
 0x204   : > { %v2964_v11 = vpop.f32.mrf.mxu1  ;;  %3085 = vmatmul.mubr.f32.gmra.mxu0 %v1948_v15 }
 0x205   : > { %v1949_v6 = vmax.f32 %v1687_v42, 0.0  ;;  %v1702_v7 = vadd.f32 %v2964_v11, %v4128_v58 }
 0x206   : > { %v1696_v26 = vpop.f32.mrf.mxu1 }
 0x207   : > { %v1697_v50 = vadd.f32 %v4128_v58, %v1696_v26  ;;  %3087 = vmatprep.mubr.f32.mxu0 %v1949_v6  ;;  %v1952_v9 = vmax.f32 %v1702_v7, 0.0 }
 0x208   : > { %v2967_v41 = vpop.f32.mrf.mxu1  ;;  %3088 = vmatmul.mubr.f32.gmra.mxu0 %v1950_v44 }
 0x209   : > { %v1951_v49 = vmax.f32 %v1697_v50, 0.0  ;;  %v1712_v27 = vadd.f32 %v2967_v41, %v4128_v58 }
 0x20a   : > { %v1706_v22 = vpop.f32.mrf.mxu1 }
 0x20b   : > { %v1707_v31 = vadd.f32 %v4128_v58, %v1706_v22  ;;  %3090 = vmatprep.mubr.f32.mxu0 %v1951_v49  ;;  %v1954_v48 = vmax.f32 %v1712_v27, 0.0 }
 0x20c   : > { %v2970_v28 = vpop.f32.mrf.mxu1  ;;  %3091 = vmatmul.mubr.f32.gmra.mxu0 %v1952_v9 }
 0x20d   : > { %v1953_v16 = vmax.f32 %v1707_v31, 0.0  ;;  %v1722_v19 = vadd.f32 %v2970_v28, %v4128_v58 }
 0x20e   : > { %v1716_v52 = vpop.f32.mrf.mxu1 }
 0x20f   : > { %v1717_v39 = vadd.f32 %v4128_v58, %v1716_v52  ;;  %3093 = vmatprep.mubr.f32.mxu0 %v1953_v16  ;;  %v1956_v1 = vmax.f32 %v1722_v19, 0.0 }
 0x210   : > { %v2973_v32 = vpop.f32.mrf.mxu1  ;;  %3094 = vmatmul.mubr.f32.gmra.mxu0 %v1954_v48 }
 0x211   : > { %v1955_v37 = vmax.f32 %v1717_v39, 0.0  ;;  %v1732_v43 = vadd.f32 %v2973_v32, %v4128_v58 }
 0x212   : > { %v1726_v3 = vpop.f32.mrf.mxu1 }
 0x213   : > { %v1727_v14 = vadd.f32 %v4128_v58, %v1726_v3  ;;  %3096 = vmatprep.mubr.f32.mxu0 %v1955_v37  ;;  %v1958_v54 = vmax.f32 %v1732_v43, 0.0 }
 0x214   : > { %v2976_v8 = vpop.f32.mrf.mxu1  ;;  %3097 = vmatmul.mubr.f32.gmra.mxu0 %v1956_v1 }
 0x215   : > { %v1957_v5 = vmax.f32 %v1727_v14, 0.0  ;;  %v1742_v34 = vadd.f32 %v2976_v8, %v4128_v58 }
 0x216   : > { %v1736_v55 = vpop.f32.mrf.mxu1 }
 0x217   : > { %v1737_v13 = vadd.f32 %v4128_v58, %v1736_v55  ;;  %3099 = vmatprep.mubr.f32.mxu0 %v1957_v5  ;;  %v1960_v36 = vmax.f32 %v1742_v34, 0.0 }
 0x218   : > { %v2979_v63 = vpop.f32.mrf.mxu1  ;;  %3100 = vmatmul.mubr.f32.gmra.mxu0 %v1958_v54 }
 0x219   : > { %v1959_v17 = vmax.f32 %v1737_v13, 0.0  ;;  %v1752_v29 = vadd.f32 %v2979_v63, %v4128_v58 }
 0x21a   : > { %v1746_v56 = vpop.f32.mrf.mxu1 }
 0x21b   : > { %v1747_v60 = vadd.f32 %v4128_v58, %v1746_v56  ;;  %3102 = vmatprep.mubr.f32.mxu0 %v1959_v17  ;;  %v1962_v21 = vmax.f32 %v1752_v29, 0.0 }
 0x21c   : > { %v2982_v45 = vpop.f32.mrf.mxu1  ;;  %3103 = vmatmul.mubr.f32.gmra.mxu0 %v1960_v36 }
 0x21d   : > { %v1961_v10 = vmax.f32 %v1747_v60, 0.0  ;;  %v1762_v30 = vadd.f32 %v2982_v45, %v4128_v58 }
 0x21e   : > { %v1756_v20 = vpop.f32.mrf.mxu1 }
 0x21f   : > { %v1757_v23 = vadd.f32 %v4128_v58, %v1756_v20  ;;  %3105 = vmatprep.mubr.f32.mxu0 %v1961_v10  ;;  %v1964_v0 = vmax.f32 %v1762_v30, 0.0 }
 0x220   : > { %v2985_v47 = vpop.f32.mrf.mxu1  ;;  %3106 = vmatmul.mubr.f32.gmra.mxu0 %v1962_v21 }
 0x221   : > { %v1963_v46 = vmax.f32 %v1757_v23, 0.0  ;;  %v1772_v24 = vadd.f32 %v2985_v47, %v4128_v58 }
 0x222   : > { %v1766_v18 = vpop.f32.mrf.mxu1 }
 0x223   : > { %v1767_v35 = vadd.f32 %v4128_v58, %v1766_v18  ;;  %3108 = vmatprep.mubr.f32.mxu0 %v1963_v46  ;;  %v1966_v12 = vmax.f32 %v1772_v24, 0.0 }
 0x224   : > { %v2988_v2 = vpop.f32.mrf.mxu1  ;;  %3109 = vmatmul.mubr.f32.gmra.mxu0 %v1964_v0 }
 0x225   : > { %v1965_v38 = vmax.f32 %v1767_v35, 0.0  ;;  %v1782_v53 = vadd.f32 %v2988_v2, %v4128_v58 }
 0x226   : > { %v1776_v33 = vpop.f32.mrf.mxu1 }
 0x227   : > { %v1777_v61 = vadd.f32 %v4128_v58, %v1776_v33  ;;  %3111 = vmatprep.mubr.f32.mxu0 %v1965_v38  ;;  %v1968_v62 = vmax.f32 %v1782_v53, 0.0 }
 0x228   : > { %v2991_v51 = vpop.f32.mrf.mxu1  ;;  %3112 = vmatmul.mubr.f32.gmra.mxu0 %v1966_v12 }
 0x229   : > { %v1967_v59 = vmax.f32 %v1777_v61, 0.0  ;;  %v1792_v25 = vadd.f32 %v2991_v51, %v4128_v58 }
 0x22a   : > { %v1786_v40 = vpop.f32.mrf.mxu1 }
 0x22b   : > { %v1787_v15 = vadd.f32 %v4128_v58, %v1786_v40  ;;  %3114 = vmatprep.mubr.f32.mxu0 %v1967_v59  ;;  %v1970_v42 = vmax.f32 %v1792_v25, 0.0 }
 0x22c   : > { %v2994_v4 = vpop.f32.mrf.mxu1  ;;  %3115 = vmatmul.mubr.f32.gmra.mxu0 %v1968_v62 }
 0x22d   : > { %v1969_v57 = vmax.f32 %v1787_v15, 0.0  ;;  %v1802_v11 = vadd.f32 %v2994_v4, %v4128_v58 }
 0x22e   : > { %v1796_v6 = vpop.f32.mrf.mxu1 }
 0x22f   : > { %v1797_v44 = vadd.f32 %v4128_v58, %v1796_v6  ;;  %3117 = vmatprep.mubr.f32.mxu0 %v1969_v57  ;;  %v1972_v50 = vmax.f32 %v1802_v11, 0.0 }
 0x230   : > { %v2997_v7 = vpop.f32.mrf.mxu1  ;;  %3118 = vmatmul.mubr.f32.gmra.mxu0 %v1970_v42 }
 0x231   : > { %v1971_v26 = vmax.f32 %v1797_v44, 0.0  ;;  %v1812_v41 = vadd.f32 %v2997_v7, %v4128_v58 }
 0x232   : > { %v1806_v49 = vpop.f32.mrf.mxu1 }
 0x233   : > { %v1807_v9 = vadd.f32 %v4128_v58, %v1806_v49  ;;  %3120 = vmatprep.mubr.f32.mxu0 %v1971_v26  ;;  %v1974_v31 = vmax.f32 %v1812_v41, 0.0 }
 0x234   : > { %v3000_v27 = vpop.f32.mrf.mxu1  ;;  %3121 = vmatmul.mubr.f32.gmra.mxu0 %v1972_v50 }
 0x235   : > { %v1973_v22 = vmax.f32 %v1807_v9, 0.0  ;;  %v1822_v28 = vadd.f32 %v3000_v27, %v4128_v58 }
 0x236   : > { %v1816_v16 = vpop.f32.mrf.mxu1 }
 0x237   : > { %v1817_v48 = vadd.f32 %v4128_v58, %v1816_v16  ;;  %3123 = vmatprep.mubr.f32.mxu0 %v1973_v22  ;;  %v1976_v39 = vmax.f32 %v1822_v28, 0.0 }
 0x238   : > { %v3003_v19 = vpop.f32.mrf.mxu1  ;;  %3124 = vmatmul.mubr.f32.gmra.mxu0 %v1974_v31 }
 0x239   : > { %v1975_v52 = vmax.f32 %v1817_v48, 0.0  ;;  %v1832_v32 = vadd.f32 %v3003_v19, %v4128_v58 }
 0x23a   : > { %v1826_v37 = vpop.f32.mrf.mxu1 }
 0x23b   : > { %v1827_v1 = vadd.f32 %v4128_v58, %v1826_v37  ;;  %3126 = vmatprep.mubr.f32.mxu0 %v1975_v52  ;;  %v1978_v14 = vmax.f32 %v1832_v32, 0.0 }
 0x23c   : > { %v3006_v43 = vpop.f32.mrf.mxu1  ;;  %3127 = vmatmul.mubr.f32.gmra.mxu0 %v1976_v39 }
 0x23d   : > { %v1977_v3 = vmax.f32 %v1827_v1, 0.0  ;;  %v1842_v8 = vadd.f32 %v3006_v43, %v4128_v58  ;;  %v4197_v43 = vld [vmem:[%s4284_s8] ss:$0 sm:$0xff] }
 0x23e   : > { %v1836_v5 = vpop.f32.mrf.mxu1 }
 0x23f   : > { %v1837_v54 = vadd.f32 %v4128_v58, %v1836_v5  ;;  %3129 = vmatprep.mubr.f32.mxu0 %v1977_v3  ;;  %v1980_v13 = vmax.f32 %v1842_v8, 0.0 }
 0x240   : > { %v3009_v34 = vpop.f32.mrf.mxu1  ;;  %3130 = vmatmul.mubr.f32.gmra.mxu0 %v1978_v14 }
 0x241   : > { %v1979_v55 = vmax.f32 %v1837_v54, 0.0  ;;  %v1852_v63 = vadd.f32 %v3009_v34, %v4128_v58 }
 0x242   : > { %v1846_v17 = vpop.f32.mrf.mxu1 }
 0x243   : > { %v1847_v36 = vadd.f32 %v4128_v58, %v1846_v17  ;;  %3132 = vmatprep.mubr.f32.mxu0 %v1979_v55  ;;  %v1982_v60 = vmax.f32 %v1852_v63, 0.0 }
 0x244   : > { %v3012_v29 = vpop.f32.mrf.mxu1  ;;  %3133 = vmatmul.mubr.f32.gmra.mxu0 %v1980_v13 }
 0x245   : > { %v1981_v56 = vmax.f32 %v1847_v36, 0.0  ;;  %v1862_v45 = vadd.f32 %v3012_v29, %v4128_v58 }
 0x246   : > { %v1856_v10 = vpop.f32.mrf.mxu1 }
 0x247   : > { %v1857_v21 = vadd.f32 %v4128_v58, %v1856_v10  ;;  %3135 = vmatprep.mubr.f32.mxu0 %v1981_v56  ;;  %v1984_v23 = vmax.f32 %v1862_v45, 0.0 }
 0x248   : > { %v3015_v30 = vpop.f32.mrf.mxu1  ;;  %3136 = vmatmul.mubr.f32.gmra.mxu0 %v1982_v60 }
 0x249   : > { %v1983_v20 = vmax.f32 %v1857_v21, 0.0  ;;  %v1872_v47 = vadd.f32 %v3015_v30, %v4128_v58 }
 0x24a   : > { %v1866_v46 = vpop.f32.mrf.mxu1 }
 0x24b   : > { %v1867_v0 = vadd.f32 %v4128_v58, %v1866_v46  ;;  %3138 = vmatprep.mubr.f32.mxu0 %v1983_v20  ;;  %v1986_v35 = vmax.f32 %v1872_v47, 0.0 }
 0x24c   : > { %v3018_v24 = vpop.f32.mrf.mxu1  ;;  %3139 = vmatmul.mubr.f32.gmra.mxu0 %v1984_v23 }
 0x24d   : > { %v1985_v18 = vmax.f32 %v1867_v0, 0.0  ;;  %v1882_v2 = vadd.f32 %v3018_v24, %v4128_v58 }
 0x24e   : > { %v1876_v38 = vpop.f32.mrf.mxu1 }
 0x24f   : > { %v1877_v12 = vadd.f32 %v4128_v58, %v1876_v38  ;;  %3141 = vmatprep.mubr.f32.mxu0 %v1985_v18  ;;  %v1988_v61 = vmax.f32 %v1882_v2, 0.0 }
 0x250   : > { %v3021_v53 = vpop.f32.mrf.mxu1  ;;  %3142 = vmatmul.mubr.f32.gmra.mxu0 %v1986_v35 }
 0x251   : > { %v1987_v33 = vmax.f32 %v1877_v12, 0.0  ;;  %v1892_v51 = vadd.f32 %v3021_v53, %v4128_v58 }
 0x252   : > { %v1886_v59 = vpop.f32.mrf.mxu1 }
 0x253   : > { %v1887_v62 = vadd.f32 %v4128_v58, %v1886_v59  ;;  %3144 = vmatprep.mubr.f32.mxu0 %v1987_v33  ;;  %v1990_v15 = vmax.f32 %v1892_v51, 0.0 }
 0x254   : > { %v3024_v25 = vpop.f32.mrf.mxu1  ;;  %3145 = vmatmul.mubr.f32.gmra.mxu0 %v1988_v61 }
 0x255   : > { %v1989_v40 = vmax.f32 %v1887_v62, 0.0  ;;  %v1902_v4 = vadd.f32 %v3024_v25, %v4128_v58 }
 0x256   : > { %v1896_v57 = vpop.f32.mrf.mxu1 }
 0x257   : > { %v1897_v42 = vadd.f32 %v4128_v58, %v1896_v57  ;;  %3147 = vmatprep.mubr.f32.mxu0 %v1989_v40  ;;  %v1992_v44 = vmax.f32 %v1902_v4, 0.0 }
 0x258   : > { %v3027_v11 = vpop.f32.mrf.mxu1  ;;  %3148 = vmatmul.mubr.f32.gmra.mxu0 %v1990_v15 }
 0x259   : > { %v1991_v6 = vmax.f32 %v1897_v42, 0.0  ;;  %v1912_v7 = vadd.f32 %v3027_v11, %v4128_v58 }
 0x25a   : > { %v1906_v26 = vpop.f32.mrf.mxu1 }
 0x25b   : > { %v1907_v50 = vadd.f32 %v4128_v58, %v1906_v26  ;;  %3150 = vmatprep.mubr.f32.mxu0 %v1991_v6  ;;  %v1994_v9 = vmax.f32 %v1912_v7, 0.0 }
 0x25c   : > { %v3030_v41 = vpop.f32.mrf.mxu1  ;;  %3151 = vmatmul.mubr.f32.gmra.mxu0 %v1992_v44 }
 0x25d   : > { %v1993_v49 = vmax.f32 %v1907_v50, 0.0  ;;  %v1922_v27 = vadd.f32 %v3030_v41, %v4128_v58 }
 0x25e   : > { %v1916_v22 = vpop.f32.mrf.mxu1 }
 0x25f   : > { %v1917_v31 = vadd.f32 %v4128_v58, %v1916_v22  ;;  %3153 = vmatprep.mubr.f32.mxu1 %v1993_v49  ;;  %v1996_v48 = vmax.f32 %v1922_v27, 0.0 }
 0x260   : > { %v3033_v28 = vpop.f32.mrf.mxu1  ;;  %3154 = vmatmul.mubr.f32.vlgmr.msra.gmra.mxu1 %v1994_v9 }
 0x261   : > { %v1995_v16 = vmax.f32 %v1917_v31, 0.0  ;;  %v1932_v19 = vadd.f32 %v3033_v28, %v4128_v58 }
 0x262   : > { %v1926_v52 = vpop.f32.mrf.mxu1 }
 0x263   : > { %v1927_v39 = vadd.f32 %v4128_v58, %v1926_v52  ;;  %3156 = vmatprep.mubr.f32.mxu1 %v1995_v16  ;;  %v1998_v37 = vmax.f32 %v1932_v19, 0.0 }
 0x264   : > { %3157 = vmatmul.mubr.f32.gmra.mxu1 %v1996_v48 }
 0x265   : > { %v1997_v32 = vmax.f32 %v1927_v39, 0.0 }
 0x267   : > { %3159 = vmatprep.mubr.f32.mxu1 %v1997_v32 }
 0x268   : > { %3160 = vmatmul.mubr.f32.gmra.mxu1 %v1998_v37 }
 0x2ac   : > { %v3068_v1 = vpop.f32.mrf.mxu0 }
 0x2ad   : > { %v2094_v14 = vadd.f32 %v3068_v1, %v4197_v43 }
 0x2ae   : > { %v2088_v3 = vpop.f32.mrf.mxu0 }
 0x2af   : > { %v2089_v8 = vadd.f32 %v4197_v43, %v2088_v3  ;;  %v2408_v34 = vmax.f32 %v2094_v14, 0.0 }
 0x2b0   : > { %v3071_v5 = vpop.f32.mrf.mxu0 }
 0x2b1   : > { %v2407_v54 = vmax.f32 %v2089_v8, 0.0  ;;  %v2104_v55 = vadd.f32 %v3071_v5, %v4197_v43 }
 0x2b2   : > { %v2098_v58 = vpop.f32.mrf.mxu0 }
 0x2b3   : > { %v2099_v13 = vadd.f32 %v4197_v43, %v2098_v58  ;;  %v2471_v17 = vadd.f32 %v2408_v34, %v2407_v54  ;;  %v2410_v56 = vmax.f32 %v2104_v55, 0.0 }
 0x2b4   : > { %v3074_v63 = vpop.f32.mrf.mxu0 }
 0x2b5   : > { %v2409_v36 = vmax.f32 %v2099_v13, 0.0  ;;  %v2114_v45 = vadd.f32 %v3074_v63, %v4197_v43 }
 0x2b6   : > { %v2108_v29 = vpop.f32.mrf.mxu0 }
 0x2b7   : > { %v2472_v60 = vadd.f32 %v2471_v17, %v2409_v36  ;;  %v2109_v10 = vadd.f32 %v4197_v43, %v2108_v29  ;;  %v2412_v47 = vmax.f32 %v2114_v45, 0.0 }
 0x2b8   : > { %v3077_v21 = vpop.f32.mrf.mxu0 }
 0x2b9   : > { %v2411_v30 = vmax.f32 %v2109_v10, 0.0  ;;  %v2473_v20 = vadd.f32 %v2472_v60, %v2410_v56  ;;  %v2124_v0 = vadd.f32 %v3077_v21, %v4197_v43 }
 0x2ba   : > { %v2118_v23 = vpop.f32.mrf.mxu0 }
 0x2bb   : > { %v2474_v46 = vadd.f32 %v2473_v20, %v2411_v30  ;;  %v2119_v24 = vadd.f32 %v4197_v43, %v2118_v23  ;;  %v2414_v12 = vmax.f32 %v2124_v0, 0.0 }
 0x2bc   : > { %v3080_v18 = vpop.f32.mrf.mxu0 }
 0x2bd   : > { %v2413_v35 = vmax.f32 %v2119_v24, 0.0  ;;  %v2475_v2 = vadd.f32 %v2474_v46, %v2412_v47  ;;  %v2134_v33 = vadd.f32 %v3080_v18, %v4197_v43 }
 0x2be   : > { %v2128_v38 = vpop.f32.mrf.mxu0 }
 0x2bf   : > { %v2476_v53 = vadd.f32 %v2475_v2, %v2413_v35  ;;  %v2129_v61 = vadd.f32 %v4197_v43, %v2128_v38  ;;  %v2416_v40 = vmax.f32 %v2134_v33, 0.0 }
 0x2c0   : > { %v3083_v51 = vpop.f32.mrf.mxu0 }
 0x2c1   : > { %v2415_v59 = vmax.f32 %v2129_v61, 0.0  ;;  %v2477_v62 = vadd.f32 %v2476_v53, %v2414_v12  ;;  %v2144_v4 = vadd.f32 %v3083_v51, %v4197_v43 }
 0x2c2   : > { %v2138_v25 = vpop.f32.mrf.mxu0 }
 0x2c3   : > { %v2478_v15 = vadd.f32 %v2477_v62, %v2415_v59  ;;  %v2139_v57 = vadd.f32 %v4197_v43, %v2138_v25  ;;  %v2418_v7 = vmax.f32 %v2144_v4, 0.0 }
 0x2c4   : > { %v3086_v42 = vpop.f32.mrf.mxu0 }
 0x2c5   : > { %v2417_v11 = vmax.f32 %v2139_v57, 0.0  ;;  %v2479_v6 = vadd.f32 %v2478_v15, %v2416_v40  ;;  %v2154_v50 = vadd.f32 %v3086_v42, %v4197_v43 }
 0x2c6   : > { %v2148_v44 = vpop.f32.mrf.mxu0 }
 0x2c7   : > { %v2480_v26 = vadd.f32 %v2479_v6, %v2417_v11  ;;  %v2149_v41 = vadd.f32 %v4197_v43, %v2148_v44  ;;  %v2420_v31 = vmax.f32 %v2154_v50, 0.0 }
 0x2c8   : > { %v3089_v49 = vpop.f32.mrf.mxu0 }
 0x2c9   : > { %v2419_v9 = vmax.f32 %v2149_v41, 0.0  ;;  %v2481_v27 = vadd.f32 %v2480_v26, %v2418_v7  ;;  %v2164_v16 = vadd.f32 %v3089_v49, %v4197_v43 }
 0x2ca   : > { %v2158_v22 = vpop.f32.mrf.mxu0 }
 0x2cb   : > { %v2482_v28 = vadd.f32 %v2481_v27, %v2419_v9  ;;  %v2159_v48 = vadd.f32 %v4197_v43, %v2158_v22  ;;  %v2422_v37 = vmax.f32 %v2164_v16, 0.0 }
 0x2cc   : > { %v3092_v19 = vpop.f32.mrf.mxu0 }
 0x2cd   : > { %v2421_v52 = vmax.f32 %v2159_v48, 0.0  ;;  %v2483_v39 = vadd.f32 %v2482_v28, %v2420_v31  ;;  %v2174_v3 = vadd.f32 %v3092_v19, %v4197_v43 }
 0x2ce   : > { %v2168_v32 = vpop.f32.mrf.mxu0 }
 0x2cf   : > { %v2484_v1 = vadd.f32 %v2483_v39, %v2421_v52  ;;  %v2169_v14 = vadd.f32 %v4197_v43, %v2168_v32  ;;  %v2424_v34 = vmax.f32 %v2174_v3, 0.0 }
 0x2d0   : > { %v3095_v8 = vpop.f32.mrf.mxu0 }
 0x2d1   : > { %v2423_v5 = vmax.f32 %v2169_v14, 0.0  ;;  %v2485_v54 = vadd.f32 %v2484_v1, %v2422_v37  ;;  %v2184_v13 = vadd.f32 %v3095_v8, %v4197_v43 }
 0x2d2   : > { %v2178_v58 = vpop.f32.mrf.mxu0 }
 0x2d3   : > { %v2486_v55 = vadd.f32 %v2485_v54, %v2423_v5  ;;  %v2179_v63 = vadd.f32 %v4197_v43, %v2178_v58  ;;  %v2426_v60 = vmax.f32 %v2184_v13, 0.0 }
 0x2d4   : > { %v3098_v17 = vpop.f32.mrf.mxu0 }
 0x2d5   : > { %v2425_v36 = vmax.f32 %v2179_v63, 0.0  ;;  %v2487_v29 = vadd.f32 %v2486_v55, %v2424_v34  ;;  %v2194_v10 = vadd.f32 %v3098_v17, %v4197_v43 }
 0x2d6   : > { %v2188_v56 = vpop.f32.mrf.mxu0 }
 0x2d7   : > { %v2488_v45 = vadd.f32 %v2487_v29, %v2425_v36  ;;  %v2189_v21 = vadd.f32 %v4197_v43, %v2188_v56  ;;  %v2428_v46 = vmax.f32 %v2194_v10, 0.0 }
 0x2d8   : > { %v3101_v30 = vpop.f32.mrf.mxu0 }
 0x2d9   : > { %v2427_v20 = vmax.f32 %v2189_v21, 0.0  ;;  %v2489_v23 = vadd.f32 %v2488_v45, %v2426_v60  ;;  %v2204_v24 = vadd.f32 %v3101_v30, %v4197_v43 }
 0x2da   : > { %v2198_v47 = vpop.f32.mrf.mxu0 }
 0x2db   : > { %v2490_v0 = vadd.f32 %v2489_v23, %v2427_v20  ;;  %v2199_v18 = vadd.f32 %v4197_v43, %v2198_v47  ;;  %v2430_v53 = vmax.f32 %v2204_v24, 0.0 }
 0x2dc   : > { %v3104_v35 = vpop.f32.mrf.mxu0 }
 0x2dd   : > { %v2429_v2 = vmax.f32 %v2199_v18, 0.0  ;;  %v2491_v38 = vadd.f32 %v2490_v0, %v2428_v46  ;;  %v2214_v61 = vadd.f32 %v3104_v35, %v4197_v43 }
 0x2de   : > { %v2208_v12 = vpop.f32.mrf.mxu0 }
 0x2df   : > { %v2492_v33 = vadd.f32 %v2491_v38, %v2429_v2  ;;  %v2209_v51 = vadd.f32 %v4197_v43, %v2208_v12  ;;  %v2432_v15 = vmax.f32 %v2214_v61, 0.0 }
 0x2e0   : > { %v3107_v59 = vpop.f32.mrf.mxu0 }
 0x2e1   : > { %v2431_v62 = vmax.f32 %v2209_v51, 0.0  ;;  %v2493_v25 = vadd.f32 %v2492_v33, %v2430_v53  ;;  %v2224_v57 = vadd.f32 %v3107_v59, %v4197_v43 }
 0x2e2   : > { %v2218_v40 = vpop.f32.mrf.mxu0 }
 0x2e3   : > { %v2494_v4 = vadd.f32 %v2493_v25, %v2431_v62  ;;  %v2219_v42 = vadd.f32 %v4197_v43, %v2218_v40  ;;  %v2434_v26 = vmax.f32 %v2224_v57, 0.0 }
 0x2e4   : > { %v3110_v11 = vpop.f32.mrf.mxu0 }
 0x2e5   : > { %v2433_v6 = vmax.f32 %v2219_v42, 0.0  ;;  %v2495_v44 = vadd.f32 %v2494_v4, %v2432_v15  ;;  %v2234_v41 = vadd.f32 %v3110_v11, %v4197_v43 }
 0x2e6   : > { %v2228_v7 = vpop.f32.mrf.mxu0 }
 0x2e7   : > { %v2496_v50 = vadd.f32 %v2495_v44, %v2433_v6  ;;  %v2229_v49 = vadd.f32 %v4197_v43, %v2228_v7  ;;  %v2436_v28 = vmax.f32 %v2234_v41, 0.0 }
 0x2e8   : > { %v3113_v9 = vpop.f32.mrf.mxu0 }
 0x2e9   : > { %v2435_v27 = vmax.f32 %v2229_v49, 0.0  ;;  %v2497_v22 = vadd.f32 %v2496_v50, %v2434_v26  ;;  %v2244_v48 = vadd.f32 %v3113_v9, %v4197_v43 }
 0x2ea   : > { %v2238_v31 = vpop.f32.mrf.mxu0 }
 0x2eb   : > { %v2498_v16 = vadd.f32 %v2497_v22, %v2435_v27  ;;  %v2239_v19 = vadd.f32 %v4197_v43, %v2238_v31  ;;  %v2438_v1 = vmax.f32 %v2244_v48, 0.0 }
 0x2ec   : > { %v3116_v52 = vpop.f32.mrf.mxu0 }
 0x2ed   : > { %v2437_v39 = vmax.f32 %v2239_v19, 0.0  ;;  %v2499_v32 = vadd.f32 %v2498_v16, %v2436_v28  ;;  %v2254_v14 = vadd.f32 %v3116_v52, %v4197_v43 }
 0x2ee   : > { %v2248_v37 = vpop.f32.mrf.mxu0 }
 0x2ef   : > { %v2500_v3 = vadd.f32 %v2499_v32, %v2437_v39  ;;  %v2249_v8 = vadd.f32 %v4197_v43, %v2248_v37  ;;  %v2440_v55 = vmax.f32 %v2254_v14, 0.0 }
 0x2f0   : > { %v3119_v5 = vpop.f32.mrf.mxu0 }
 0x2f1   : > { %v2439_v54 = vmax.f32 %v2249_v8, 0.0  ;;  %v2501_v58 = vadd.f32 %v2500_v3, %v2438_v1  ;;  %v2264_v63 = vadd.f32 %v3119_v5, %v4197_v43 }
 0x2f2   : > { %v2258_v34 = vpop.f32.mrf.mxu0 }
 0x2f3   : > { %v2502_v13 = vadd.f32 %v2501_v58, %v2439_v54  ;;  %v2259_v17 = vadd.f32 %v4197_v43, %v2258_v34  ;;  %v2442_v45 = vmax.f32 %v2264_v63, 0.0 }
 0x2f4   : > { %v3122_v36 = vpop.f32.mrf.mxu0 }
 0x2f5   : > { %v2441_v29 = vmax.f32 %v2259_v17, 0.0  ;;  %v2503_v56 = vadd.f32 %v2502_v13, %v2440_v55  ;;  %v2274_v21 = vadd.f32 %v3122_v36, %v4197_v43 }
 0x2f6   : > { %v2268_v60 = vpop.f32.mrf.mxu0 }
 0x2f7   : > { %v2504_v10 = vadd.f32 %v2503_v56, %v2441_v29  ;;  %v2269_v30 = vadd.f32 %v4197_v43, %v2268_v60  ;;  %v2444_v0 = vmax.f32 %v2274_v21, 0.0 }
 0x2f8   : > { %v3125_v20 = vpop.f32.mrf.mxu0 }
 0x2f9   : > { %v2443_v23 = vmax.f32 %v2269_v30, 0.0  ;;  %v2505_v47 = vadd.f32 %v2504_v10, %v2442_v45  ;;  %v2284_v18 = vadd.f32 %v3125_v20, %v4197_v43 }
 0x2fa   : > { %v2278_v46 = vpop.f32.mrf.mxu0 }
 0x2fb   : > { %v2506_v24 = vadd.f32 %v2505_v47, %v2443_v23  ;;  %v2279_v35 = vadd.f32 %v4197_v43, %v2278_v46  ;;  %v2446_v33 = vmax.f32 %v2284_v18, 0.0 }
 0x2fc   : > { %v3128_v2 = vpop.f32.mrf.mxu0 }
 0x2fd   : > { %v2445_v38 = vmax.f32 %v2279_v35, 0.0  ;;  %v2507_v12 = vadd.f32 %v2506_v24, %v2444_v0  ;;  %v2294_v51 = vadd.f32 %v3128_v2, %v4197_v43 }
 0x2fe   : > { %v2288_v53 = vpop.f32.mrf.mxu0 }
 0x2ff   : > { %v2508_v61 = vadd.f32 %v2507_v12, %v2445_v38  ;;  %v2289_v59 = vadd.f32 %v4197_v43, %v2288_v53  ;;  %v2448_v4 = vmax.f32 %v2294_v51, 0.0 }
 0x300   : > { %v3131_v62 = vpop.f32.mrf.mxu0 }
 0x301   : > { %v2447_v25 = vmax.f32 %v2289_v59, 0.0  ;;  %v2509_v40 = vadd.f32 %v2508_v61, %v2446_v33  ;;  %v2304_v42 = vadd.f32 %v3131_v62, %v4197_v43 }
 0x302   : > { %v2298_v15 = vpop.f32.mrf.mxu0 }
 0x303   : > { %v2510_v57 = vadd.f32 %v2509_v40, %v2447_v25  ;;  %v2299_v11 = vadd.f32 %v4197_v43, %v2298_v15  ;;  %v2450_v50 = vmax.f32 %v2304_v42, 0.0 }
 0x304   : > { %v3134_v6 = vpop.f32.mrf.mxu0 }
 0x305   : > { %v2449_v44 = vmax.f32 %v2299_v11, 0.0  ;;  %v2511_v7 = vadd.f32 %v2510_v57, %v2448_v4  ;;  %v2314_v49 = vadd.f32 %v3134_v6, %v4197_v43 }
 0x306   : > { %v2308_v26 = vpop.f32.mrf.mxu0 }
 0x307   : > { %v2512_v41 = vadd.f32 %v2511_v7, %v2449_v44  ;;  %v2309_v9 = vadd.f32 %v4197_v43, %v2308_v26  ;;  %v2452_v16 = vmax.f32 %v2314_v49, 0.0 }
 0x308   : > { %v3137_v27 = vpop.f32.mrf.mxu0 }
 0x309   : > { %v2451_v22 = vmax.f32 %v2309_v9, 0.0  ;;  %v2513_v31 = vadd.f32 %v2512_v41, %v2450_v50  ;;  %v2324_v19 = vadd.f32 %v3137_v27, %v4197_v43 }
 0x30a   : > { %v2318_v28 = vpop.f32.mrf.mxu0 }
 0x30b   : > { %v2514_v48 = vadd.f32 %v2513_v31, %v2451_v22  ;;  %v2319_v52 = vadd.f32 %v4197_v43, %v2318_v28  ;;  %v2454_v3 = vmax.f32 %v2324_v19, 0.0 }
 0x30c   : > { %v3140_v39 = vpop.f32.mrf.mxu0 }
 0x30d   : > { %v2453_v32 = vmax.f32 %v2319_v52, 0.0  ;;  %v2515_v37 = vadd.f32 %v2514_v48, %v2452_v16  ;;  %v2334_v8 = vadd.f32 %v3140_v39, %v4197_v43 }
 0x30e   : > { %v2328_v1 = vpop.f32.mrf.mxu0 }
 0x30f   : > { %v2516_v14 = vadd.f32 %v2515_v37, %v2453_v32  ;;  %v2329_v5 = vadd.f32 %v4197_v43, %v2328_v1  ;;  %v2456_v13 = vmax.f32 %v2334_v8, 0.0 }
 0x310   : > { %v3143_v54 = vpop.f32.mrf.mxu0 }
 0x311   : > { %v2455_v58 = vmax.f32 %v2329_v5, 0.0  ;;  %v2517_v34 = vadd.f32 %v2516_v14, %v2454_v3  ;;  %v2344_v17 = vadd.f32 %v3143_v54, %v4197_v43 }
 0x312   : > { %v2338_v55 = vpop.f32.mrf.mxu0 }
 0x313   : > { %v2518_v63 = vadd.f32 %v2517_v34, %v2455_v58  ;;  %v2339_v36 = vadd.f32 %v4197_v43, %v2338_v55  ;;  %v2458_v10 = vmax.f32 %v2344_v17, 0.0 }
 0x314   : > { %v3146_v29 = vpop.f32.mrf.mxu0 }
 0x315   : > { %v2457_v56 = vmax.f32 %v2339_v36, 0.0  ;;  %v2519_v60 = vadd.f32 %v2518_v63, %v2456_v13  ;;  %v2354_v30 = vadd.f32 %v3146_v29, %v4197_v43 }
 0x316   : > { %v2348_v45 = vpop.f32.mrf.mxu0 }
 0x317   : > { %v2520_v21 = vadd.f32 %v2519_v60, %v2457_v56  ;;  %v2349_v20 = vadd.f32 %v4197_v43, %v2348_v45  ;;  %v2460_v24 = vmax.f32 %v2354_v30, 0.0 }
 0x318   : > { %v3149_v23 = vpop.f32.mrf.mxu0 }
 0x319   : > { %v2459_v47 = vmax.f32 %v2349_v20, 0.0  ;;  %v2521_v46 = vadd.f32 %v2520_v21, %v2458_v10  ;;  %v2364_v35 = vadd.f32 %v3149_v23, %v4197_v43 }
 0x31a   : > { %v2358_v0 = vpop.f32.mrf.mxu0 }
 0x31b   : > { %v2522_v18 = vadd.f32 %v2521_v46, %v2459_v47  ;;  %v2359_v2 = vadd.f32 %v4197_v43, %v2358_v0  ;;  %v2462_v61 = vmax.f32 %v2364_v35, 0.0 }
 0x31c   : > { %v3152_v38 = vpop.f32.mrf.mxu0 }
 0x31d   : > { %v2461_v12 = vmax.f32 %v2359_v2, 0.0  ;;  %v2523_v53 = vadd.f32 %v2522_v18, %v2460_v24  ;;  %v2374_v59 = vadd.f32 %v3152_v38, %v4197_v43 }
 0x31e   : > { %v2368_v33 = vpop.f32.mrf.mxu0 }
 0x31f   : > { %v2524_v51 = vadd.f32 %v2523_v53, %v2461_v12  ;;  %v2369_v62 = vadd.f32 %v4197_v43, %v2368_v33  ;;  %v2464_v57 = vmax.f32 %v2374_v59, 0.0 }
 0x320   : > { %v3155_v25 = vpop.f32.mrf.mxu1 }
 0x321   : > { %v2463_v40 = vmax.f32 %v2369_v62, 0.0  ;;  %v2525_v15 = vadd.f32 %v2524_v51, %v2462_v61  ;;  %v2384_v11 = vadd.f32 %v3155_v25, %v4197_v43 }
 0x322   : > { %v2378_v4 = vpop.f32.mrf.mxu1 }
 0x323   : > { %v2526_v42 = vadd.f32 %v2525_v15, %v2463_v40  ;;  %v2379_v6 = vadd.f32 %v4197_v43, %v2378_v4  ;;  %v2466_v41 = vmax.f32 %v2384_v11, 0.0 }
 0x324   : > { %v3158_v44 = vpop.f32.mrf.mxu1 }
 0x325   : > { %v2465_v7 = vmax.f32 %v2379_v6, 0.0  ;;  %v2527_v26 = vadd.f32 %v2526_v42, %v2464_v57  ;;  %v2394_v9 = vadd.f32 %v3158_v44, %v4197_v43 }
 0x326   : > { %v2388_v50 = vpop.f32.mrf.mxu1 }
 0x327   : > { %v2528_v49 = vadd.f32 %v2527_v26, %v2465_v7  ;;  %v2389_v27 = vadd.f32 %v4197_v43, %v2388_v50  ;;  %v2468_v48 = vmax.f32 %v2394_v9, 0.0 }
 0x328   : > { %v3161_v22 = vpop.f32.mrf.mxu1 }
 0x329   : > { %v2467_v31 = vmax.f32 %v2389_v27, 0.0  ;;  %v2529_v28 = vadd.f32 %v2528_v49, %v2466_v41  ;;  %v2404_v52 = vadd.f32 %v3161_v22, %v4197_v43 }
 0x32a   : > { %v2398_v16 = vpop.f32.mrf.mxu1 }
 0x32b   : > { %v2530_v19 = vadd.f32 %v2529_v28, %v2467_v31  ;;  %v2399_v39 = vadd.f32 %v4197_v43, %v2398_v16  ;;  %v2470_v1 = vmax.f32 %v2404_v52, 0.0 }
 0x32d   : > { %v2469_v32 = vmax.f32 %v2399_v39, 0.0  ;;  %v2531_v37 = vadd.f32 %v2530_v19, %v2468_v48 }
 0x32f   : > { %v2532_v3 = vadd.f32 %v2531_v37, %v2469_v32 }
 0x331   : > { %v2533_v14 = vadd.f32 %v2532_v3, %v2470_v1 }
 0x333   : > { %v2534_v8 = vrot.slane %v2533_v14, 4 }
 0x335   : > { %v2535_v5 = vadd.f32 %v2534_v8, %v2533_v14 }
 0x337   : > { %v2536_v54 = vrot.slane %v2535_v5, 2 }
 0x339   : > { %v2537_v58 = vadd.f32 %v2536_v54, %v2535_v5 }
 0x33b   : > { %v2538_v34 = vrot.slane %v2537_v58, 1 }
 0x33d   : > { %v2539_v55 = vadd.f32 %v2538_v34, %v2537_v58 }
 0x33f   : > { %2540 = vst [vmem:[%s424_s25] sm:$0x1] %v2539_v55 }
 0x340 PF: > { %s21_s11 = sadd.s32 1, %s3360_s11   ;;  %s4296_s30 = smov %s3356_s10 }
 0x341   : > { %p18_p2 = scmp.ge.s32.totalorder %s21_s11, 4   ;;  %s4297_s10 = smov %s4299_s18 }
 0x343   :  { %20 = sbr.rel (!%p18_p2) target bundleno = 3 (0x3), region = 102 }
 0x348   :  { %2561 = vsyncpa [#allocation3], 1 }
 0x349   :  { %2563 = vsyncpa [#allocation3 + $0x1], 1 }
 0x34a   :  { %2564 = vsyncpa [#allocation5], 1 }

</bundles_post_ra>
